<compile_context>
chip_gen: v6e
topology: v6e:2x2x1
jax: 0.10.0
libtpu: 0.0.40
codegen_flags: <defaults>
</compile_context>

<pallas_src>
import functools
import math

import jax
import jax.numpy as jnp
from jax.experimental import pallas as pl
from jax.experimental.pallas import tpu as pltpu


# ---------------------------------------------------------------------------
# Stage 1: MLP over reversed, padded relative distances -> (heads, L_pad),
# lane-dense (L on lanes).  Runs once; weights are passed pre-transposed
# ((fan_out, fan_in) / (fan_out, 1)) so every slab keeps L_pad on lanes.
# ---------------------------------------------------------------------------
def _dpb_mlp_kernel(*refs, n_pad, log_distance):
    out_ref = refs[-1]
    wb = refs[:-1]                       # (w0t, b0t, w1t, b1t, ..., wot, bot)
    n_lin = len(wb) // 2
    L_pad = out_ref.shape[1]

    m = jax.lax.broadcasted_iota(jnp.int32, (1, L_pad), 1).astype(jnp.float32)
    pos = (n_pad - 1.0) - m                              # reversed distances
    if log_distance:
        pos = jnp.sign(pos) * jnp.log(jnp.abs(pos) + 1.0)

    # Linear(1 -> dim) + SiLU; contraction dim is 1 -> broadcasted mul (VPU).
    h = wb[0][...] * pos + wb[1][...]                    # (dim, L_pad)
    h = h * jax.nn.sigmoid(h)

    # (depth - 1) x [Linear(dim -> dim) + SiLU] on the MXU (f32 HIGHEST).
    for li in range(1, n_lin - 1):
        h = jnp.dot(wb[2 * li][...], h,
                    precision=jax.lax.Precision.HIGHEST,
                    preferred_element_type=jnp.float32) + wb[2 * li + 1][...]
        h = h * jax.nn.sigmoid(h)

    # Linear(dim -> heads) -> (heads, L_pad), lane-dense.
    out_ref[...] = (jnp.dot(wb[-2][...], h,
                            precision=jax.lax.Precision.HIGHEST,
                            preferred_element_type=jnp.float32) + wb[-1][...])


# ---------------------------------------------------------------------------
# Stage 2: Toeplitz expansion from the VMEM-resident (Hb, 1, L_pad) slab.
#   bias[h, ti*T + r, tj*T + c] = outR[h, lo + (T - 1 - r + c)],
#   lo = (tj - ti + nT - 1) * T  (lane-aligned window start).
# Per head: broadcast the 2T-wide window over T rows and right-rotate row r by
# (T + 1 + r); lanes [0, T) of the result are exactly the tile.
# ---------------------------------------------------------------------------
def _toeplitz_tile_kernel(s_ref, o_ref, *, T, nT):
    ti = pl.program_id(1)
    tj = pl.program_id(2)
    lo = pl.multiple_of((tj - ti + (nT - 1)) * T, T)
    w = s_ref[:, :, pl.ds(lo, 2 * T)]                    # (Hb, 1, 2T)
    Hb = o_ref.shape[0]
    for h in range(Hb):                                  # Hb small & static
        band = jnp.broadcast_to(w[h], (T, 2 * T))        # rows identical
        rolled = pltpu.roll(band, T + 1, 1, stride=1, stride_axis=0)
        o_ref[h, :, :] = rolled[:, :T].astype(o_ref.dtype)


# ---------------------------------------------------------------------------
# Wrapper
# ---------------------------------------------------------------------------
def _round_up(x, m):
    return -(-x // m) * m


def _pick_tile(n):
    # T=256 when it divides n (bigger blocks amortize per-step overhead);
    # otherwise pad n to a multiple of 128 (lane-dense, VMEM-safe on v7x).
    if n % 256 == 0:
        return 256, n
    return 128, _round_up(n, 128)


def _pick_head_block(heads, T, budget_bytes=8 << 20):
    # Largest divisor of heads whose double-buffered output block fits budget.
    hb = heads
    while hb > 1 and 2 * hb * T * T * 4 > budget_bytes:
        hb -= 1
        while heads % hb:
            hb -= 1
    return hb


def dynamic_position_bias(qlen, klen, params, *, log_distance=False,
                          block=None, out_dtype=jnp.float32):
    """params: [(w, b)] with shapes [(1,dim), (dim,dim)*(depth-1), (dim,heads)],
    biases shaped (1, fan_out).  Returns bias of shape (heads, qlen, klen)."""
    assert qlen == klen, "DynamicPositionBias requires qlen == klen"
    n = int(klen)
    heads = params[-1][0].shape[1]

    if block is None:
        T, n_pad = _pick_tile(n)
    else:
        T = int(block)
        assert T % 128 == 0, "block must be a multiple of 128"
        n_pad = _round_up(n, T)
    nT = n_pad // T
    L_pad = 2 * n_pad

    # Pre-transposed params (wrapper-side, tiny) -> lane-dense MLP in-kernel.
    flat = []
    for w, b in params:
        flat.append(jnp.asarray(w, jnp.float32).T)                 # (fan_out, fan_in)
        flat.append(jnp.asarray(b, jnp.float32).reshape(1, -1).T)  # (fan_out, 1)

    def _full(shape):
        nd = len(shape)
        return pl.BlockSpec(shape, lambda i: (0,) * nd)

    # ---- stage 1: MLP -> outR (heads, L_pad), runs once --------------------
    outR = pl.pallas_call(
        functools.partial(_dpb_mlp_kernel, n_pad=n_pad,
                          log_distance=log_distance),
        grid=(1,),
        in_specs=[_full(a.shape) for a in flat],
        out_specs=_full((heads, L_pad)),
        out_shape=jax.ShapeDtypeStruct((heads, L_pad), jnp.float32),
    )(*flat)
    outR = outR.reshape(heads, 1, L_pad)     # (head, 1, lane) layout for stage 2

    # ---- stage 2: tiled Toeplitz writeback (VMEM-resident source) ----------
    Hb = _pick_head_block(heads, T)
    grid = (heads // Hb, nT, nT)
    bias = pl.pallas_call(
        functools.partial(_toeplitz_tile_kernel, T=T, nT=nT),
        grid=grid,
        in_specs=[pl.BlockSpec((Hb, 1, L_pad), lambda h, ti, tj: (h, 0, 0))],
        out_specs=pl.BlockSpec((Hb, T, T), lambda h, ti, tj: (h, ti, tj)),
        out_shape=jax.ShapeDtypeStruct((heads, n_pad, n_pad), out_dtype),
        compiler_params=pltpu.CompilerParams(
            dimension_semantics=("parallel", "parallel", "arbitrary")),
    )(outR)
    if n_pad != n:
        bias = bias[:, :n, :n]
    return bias


# ---------------------------------------------------------------------------
# Pure-JAX reference mirroring the PyTorch forward, and param init.
# ---------------------------------------------------------------------------
def _reference(qlen, klen, params, *, log_distance=False):
    n = int(klen)
    pos = jnp.arange(-n + 1, n, dtype=jnp.float32)[:, None]
    if log_distance:
        pos = jnp.sign(pos) * jnp.log(jnp.abs(pos) + 1.0)
    (w0, b0), *hidden, (wo, bo) = params
    h = jax.nn.silu(pos * w0 + b0)
    for w, b in hidden:
        h = jax.nn.silu(jnp.dot(h, w, precision=jax.lax.Precision.HIGHEST) + b)
    out = jnp.dot(h, wo, precision=jax.lax.Precision.HIGHEST) + bo   # (L, heads)
    i = jnp.arange(n)[:, None]
    j = jnp.arange(n)[None, :]
    return jnp.transpose(out[i - j + n - 1], (2, 0, 1))              # (heads, n, n)


def _init_params(key, dim, heads, depth=2):
    # torch.nn.Linear default init: uniform +-1/sqrt(fan_in).
    sizes = [(1, dim)] + [(dim, dim)] * (depth - 1) + [(dim, heads)]
    keys = jax.random.split(key, 2 * len(sizes))
    params = []
    for idx, (fi, fo) in enumerate(sizes):
        bound = 1.0 / math.sqrt(fi)
        w = jax.random.uniform(keys[2 * idx], (fi, fo), jnp.float32, -bound, bound)
        b = jax.random.uniform(keys[2 * idx + 1], (1, fo), jnp.float32, -bound, bound)
        params.append((w, b))
    return params


if __name__ == "__main__":
    dim, heads, depth = 32, 4, 2
    params = _init_params(jax.random.PRNGKey(0), dim, heads, depth)

    # (1) n=256, default tiling (T=256 -> one (heads,256,256) block).
    n = 256
    ref = _reference(n, n, params)
    bias = jax.block_until_ready(dynamic_position_bias(n, n, params))
    assert bias.shape == (heads, n, n), bias.shape
    assert jnp.allclose(bias, ref, atol=1e-2, rtol=1e-2), "mismatch (default tiling)"

    # (2) n=256 forced T=128 -> grid (1,2,2); exercises multi-tile window math.
    bias2 = jax.block_until_ready(dynamic_position_bias(n, n, params, block=128))
    assert jnp.allclose(bias2, ref, atol=1e-2, rtol=1e-2), "mismatch (T=128 tiling)"

    # (3) irregular n (padded to 128) + log_distance branch.
    n3 = 40
    bias3 = jax.block_until_ready(
        dynamic_position_bias(n3, n3, params, log_distance=True))
    ref3 = _reference(n3, n3, params, log_distance=True)
    assert bias3.shape == (heads, n3, n3), bias3.shape
    assert jnp.allclose(bias3, ref3, atol=1e-2, rtol=1e-2), "mismatch (padded path)"

    # (4) bf16 output (halves writeback traffic).
    bias4 = jax.block_until_ready(
        dynamic_position_bias(n, n, params, out_dtype=jnp.bfloat16))
    assert jnp.allclose(bias4.astype(jnp.float32), ref, atol=5e-2, rtol=2e-2), \
        "mismatch (bf16 output)"

    print("KERNEL_OK")
</pallas_src>

<mosaic_0001>
module attributes {stable_mosaic.version = 11 : i64} {
  func.func @_dpb_mlp_kernel(%arg0: i32, %arg1: memref<32x1xf32, #tpu.memory_space<vmem>>, %arg2: memref<32x1xf32, #tpu.memory_space<vmem>>, %arg3: memref<32x32xf32, #tpu.memory_space<vmem>>, %arg4: memref<32x1xf32, #tpu.memory_space<vmem>>, %arg5: memref<4x32xf32, #tpu.memory_space<vmem>>, %arg6: memref<4x1xf32, #tpu.memory_space<vmem>>, %arg7: memref<4x512xf32, #tpu.memory_space<vmem>>) attributes {dimension_semantics = [#tpu.dimension_semantics<arbitrary>], iteration_bounds = array<i64: 1>, scalar_prefetch = 0 : i64, scratch_operands = 0 : i64, tpu.core_type = #tpu.core_type<tc>, window_params = [{pipeline_mode = #tpu.pipeline_mode<synchronous>, transform_indices = @transform_0, window_bounds = array<i64: 32, 1>}, {pipeline_mode = #tpu.pipeline_mode<synchronous>, transform_indices = @transform_1, window_bounds = array<i64: 32, 1>}, {pipeline_mode = #tpu.pipeline_mode<synchronous>, transform_indices = @transform_2, window_bounds = array<i64: 32, 32>}, {pipeline_mode = #tpu.pipeline_mode<synchronous>, transform_indices = @transform_3, window_bounds = array<i64: 32, 1>}, {pipeline_mode = #tpu.pipeline_mode<synchronous>, transform_indices = @transform_4, window_bounds = array<i64: 4, 32>}, {pipeline_mode = #tpu.pipeline_mode<synchronous>, transform_indices = @transform_5, window_bounds = array<i64: 4, 1>}, {pipeline_mode = #tpu.pipeline_mode<synchronous>, transform_indices = @transform_6, window_bounds = array<i64: 4, 512>}]} {
    %0 = tpu.iota {dimensions = array<i32: 1>} : vector<1x512xi32>
    %1 = arith.sitofp %0 : vector<1x512xi32> to vector<1x512xf32>
    %cst = arith.constant 2.550000e+02 : f32
    %2 = vector.broadcast %cst : f32 to vector<1x512xf32>
    %3 = arith.subf %2, %1 : vector<1x512xf32>
    %c0 = arith.constant 0 : index
    %c0_0 = arith.constant 0 : index
    %4 = vector.load %arg1[%c0, %c0_0] : memref<32x1xf32, #tpu.memory_space<vmem>>, vector<32x1xf32>
    %5 = vector.broadcast %4 : vector<32x1xf32> to vector<32x512xf32>
    %6 = vector.broadcast %3 : vector<1x512xf32> to vector<32x512xf32>
    %7 = arith.mulf %5, %6 : vector<32x512xf32>
    %c0_1 = arith.constant 0 : index
    %c0_2 = arith.constant 0 : index
    %8 = vector.load %arg2[%c0_1, %c0_2] : memref<32x1xf32, #tpu.memory_space<vmem>>, vector<32x1xf32>
    %9 = vector.broadcast %8 : vector<32x1xf32> to vector<32x512xf32>
    %10 = arith.addf %7, %9 : vector<32x512xf32>
    %11 = arith.negf %10 : vector<32x512xf32>
    %12 = math.exp %11 : vector<32x512xf32>
    %cst_3 = arith.constant 1.000000e+00 : f32
    %13 = vector.broadcast %cst_3 : f32 to vector<32x512xf32>
    %14 = arith.addf %13, %12 : vector<32x512xf32>
    %15 = arith.divf %13, %14 : vector<32x512xf32>
    %16 = arith.mulf %10, %15 : vector<32x512xf32>
    %c0_4 = arith.constant 0 : index
    %c0_5 = arith.constant 0 : index
    %17 = vector.load %arg3[%c0_4, %c0_5] : memref<32x32xf32, #tpu.memory_space<vmem>>, vector<32x32xf32>
    %cst_6 = arith.constant dense<0.000000e+00> : vector<32x512xf32>
    %18 = tpu.matmul %17, %16, %cst_6 {dimension_numbers = #tpu.dot_dimension_numbers<[1], [0], [0], [1], [0, 0, 1, 1], [], []>, precision = #tpu.contract_precision<fp32>} : vector<32x32xf32>, vector<32x512xf32>, vector<32x512xf32> -> vector<32x512xf32>
    %c0_7 = arith.constant 0 : index
    %c0_8 = arith.constant 0 : index
    %19 = vector.load %arg4[%c0_7, %c0_8] : memref<32x1xf32, #tpu.memory_space<vmem>>, vector<32x1xf32>
    %20 = vector.broadcast %19 : vector<32x1xf32> to vector<32x512xf32>
    %21 = arith.addf %18, %20 : vector<32x512xf32>
    %22 = arith.negf %21 : vector<32x512xf32>
    %23 = math.exp %22 : vector<32x512xf32>
    %cst_9 = arith.constant 1.000000e+00 : f32
    %24 = vector.broadcast %cst_9 : f32 to vector<32x512xf32>
    %25 = arith.addf %24, %23 : vector<32x512xf32>
    %26 = arith.divf %24, %25 : vector<32x512xf32>
    %27 = arith.mulf %21, %26 : vector<32x512xf32>
    %c0_10 = arith.constant 0 : index
    %c0_11 = arith.constant 0 : index
    %28 = vector.load %arg5[%c0_10, %c0_11] : memref<4x32xf32, #tpu.memory_space<vmem>>, vector<4x32xf32>
    %cst_12 = arith.constant dense<0.000000e+00> : vector<4x512xf32>
    %29 = tpu.matmul %28, %27, %cst_12 {dimension_numbers = #tpu.dot_dimension_numbers<[1], [0], [0], [1], [0, 0, 1, 1], [], []>, precision = #tpu.contract_precision<fp32>} : vector<4x32xf32>, vector<32x512xf32>, vector<4x512xf32> -> vector<4x512xf32>
    %c0_13 = arith.constant 0 : index
    %c0_14 = arith.constant 0 : index
    %30 = vector.load %arg6[%c0_13, %c0_14] : memref<4x1xf32, #tpu.memory_space<vmem>>, vector<4x1xf32>
    %31 = vector.broadcast %30 : vector<4x1xf32> to vector<4x512xf32>
    %32 = arith.addf %29, %31 : vector<4x512xf32>
    %c0_15 = arith.constant 0 : index
    %c0_16 = arith.constant 0 : index
    %33 = vector.load %arg7[%c0_15, %c0_16] : memref<4x512xf32, #tpu.memory_space<vmem>>, vector<4x512xf32>
    tpu.vector_store %arg7[%c0_15, %c0_16], %32 {strides = array<i32>} : memref<4x512xf32, #tpu.memory_space<vmem>>, vector<4x512xf32>,
    return
  }
  func.func @transform_0(%arg0: i32) -> (i32, i32) {
    %c0_i32 = arith.constant 0 : i32
    %c0_i32_0 = arith.constant 0 : i32
    %c0_i32_1 = arith.constant 0 : i32
    return %c0_i32, %c0_i32_0 : i32, i32
  }
  func.func @transform_1(%arg0: i32) -> (i32, i32) {
    %c0_i32 = arith.constant 0 : i32
    %c0_i32_0 = arith.constant 0 : i32
    %c0_i32_1 = arith.constant 0 : i32
    return %c0_i32, %c0_i32_0 : i32, i32
  }
  func.func @transform_2(%arg0: i32) -> (i32, i32) {
    %c0_i32 = arith.constant 0 : i32
    %c0_i32_0 = arith.constant 0 : i32
    %c0_i32_1 = arith.constant 0 : i32
    return %c0_i32, %c0_i32_0 : i32, i32
  }
  func.func @transform_3(%arg0: i32) -> (i32, i32) {
    %c0_i32 = arith.constant 0 : i32
    %c0_i32_0 = arith.constant 0 : i32
    %c0_i32_1 = arith.constant 0 : i32
    return %c0_i32, %c0_i32_0 : i32, i32
  }
  func.func @transform_4(%arg0: i32) -> (i32, i32) {
    %c0_i32 = arith.constant 0 : i32
    %c0_i32_0 = arith.constant 0 : i32
    %c0_i32_1 = arith.constant 0 : i32
    return %c0_i32, %c0_i32_0 : i32, i32
  }
  func.func @transform_5(%arg0: i32) -> (i32, i32) {
    %c0_i32 = arith.constant 0 : i32
    %c0_i32_0 = arith.constant 0 : i32
    %c0_i32_1 = arith.constant 0 : i32
    return %c0_i32, %c0_i32_0 : i32, i32
  }
  func.func @transform_6(%arg0: i32) -> (i32, i32) {
    %c0_i32 = arith.constant 0 : i32
    %c0_i32_0 = arith.constant 0 : i32
    %c0_i32_1 = arith.constant 0 : i32
    return %c0_i32, %c0_i32_0 : i32, i32
  }
}

</mosaic_0001>

<bundles_post_ra>
// kernel: tpu_custom_call.1
= control target key start
LH: loop header
LB: loop body
LE: loop exit
PB: predicated region body
PF: predicated region fallthrough
CT: control target
= control target key end

     0   :  { %v3069_v2 = vmov 0   ;;  %s4026_s0 = inlined_call_operand.vmem [shape: f32[32,1], index: 0, kind: input, shape index: {}]   ;;  %s4027_s1 = inlined_call_operand.vmem [shape: f32[32,1], index: 1, kind: input, shape index: {}]   ;;  %s4028_s2 = inlined_call_operand.vmem [shape: f32[32,32], index: 2, kind: input, shape index: {}]   ;;  %s4029_s3 = inlined_call_operand.vmem [shape: f32[32,1], index: 3, kind: input, shape index: {}]   ;;  %s4030_s4 = inlined_call_operand.vmem [shape: f32[4,32], index: 4, kind: input, shape index: {}]   ;;  %s4031_s5 = inlined_call_operand.vmem [shape: f32[4,1], index: 5, kind: input, shape index: {}]   ;;  %s4032_s6 = inlined_call_operand.hbm [shape: f32[4,512], index: 6, kind: output, shape index: {}]  }
   0x1   :  { %v80_v0 = vld [vmem:[%s4027_s1 + $0x18] sm:$0xff]  ;;  %2918 = vset.pattern.permute.xlu1 %v3069_v2  ;;  %2917 = vset.pattern.permute.xlu0 %v3069_v2  ;;  %v39_v3 = vld [vmem:[%s4026_s0 + $0x10] sm:$0xff]  ;;  %v38_v4 = vld [vmem:[%s4026_s0 + $0x8] sm:$0xff] }
   0x2   :  { %v40_v1 = vld [vmem:[%s4026_s0 + $0x18] sm:$0xff]  ;;  %98 = vperm.xlu1 %2918, %v80_v0  }
   0x3   :  { %58 = vperm.xlu0 %2917, %v40_v1  }
   0x4   :  { %11 = vsyncpa [#allocation3], 0  ;;  %v79_v5 = vld [vmem:[%s4027_s1 + $0x10] sm:$0xff]  ;;  %v37_v6 = vld [vmem:[%s4026_s0] sm:$0xff]  ;;  %v3070_v14 = vmov 0.0   ;;  %v24_v15 = vlaneseq  ;;  %vm257_vm0 = vcmask 261120  }
   0x5   :  { %v78_v7 = vld [vmem:[%s4027_s1 + $0x8] sm:$0xff]  ;;  %v77_v8 = vld [vmem:[%s4027_s1] sm:$0xff]  ;;  %v236_v9 = vld [vmem:[%s4029_s3 + $0x18] sm:$0xff]  ;;  %342 = vmatprep.mubr.f32.mxu0 %v3070_v14  ;;  %491 = vmatprep.mubr.f32.mxu1 %v3070_v14 }
   0x6   :  { %48 = vperm.xlu1 %2918, %v38_v4   ;;  %v235_v10 = vld [vmem:[%s4029_s3 + $0x10] sm:$0xff]  ;;  %v234_v11 = vld [vmem:[%s4029_s3 + $0x8] sm:$0xff]  ;;  %v233_v12 = vld [vmem:[%s4029_s3] sm:$0xff]  ;;  %v25_v16 = vand.u32 127, %v24_v15 }
   0x7   :  { %53 = vperm.xlu0 %2917, %v39_v3   ;;  %v1763_v13 = vld [vmem:[%s4031_s5] sm:$0xf]  ;;  %v230_v4 = vld [vmem:[%s4028_s2 + $0x8] sm:$0xff] }
   0x8   :  { %v26_v17 = vadd.s32 128, %v25_v16  ;;  %v29_v18 = vcvt.s32.f32 %v25_v16  ;;  %v28_v34 = vadd.s32 384, %v25_v16  ;;  %v229_v55 = vld [vmem:[%s4028_s2] sm:$0xff]  ;;  %v27_v58 = vadd.s32 256, %v25_v16 }
   0x9   :  { %v259_v59 = vsel %vm257_vm0, %v229_v55, 0 }
   0xa   :  { %43 = vperm.xlu1 %2918, %v37_v6   ;;  %v30_v19 = vcvt.s32.f32 %v26_v17  ;;  %v33_v20 = vsub.f32 255.0, %v29_v18  ;;  %v32_v43 = vcvt.s32.f32 %v28_v34  ;;  %v3212_v1 = vand.u32 4294901760, %v259_v59 }
   0xb   :  { %93 = vperm.xlu0 %2917, %v79_v5   ;;  %v31_v2 = vcvt.s32.f32 %v27_v58 }
   0xc   :  { %v34_v21 = vsub.f32 255.0, %v30_v19  ;;  %v3202_v54 = vsub.f32 255.0, %v32_v43  ;;  %v3221_v6 = vsub.f32 %v259_v59, %v3212_v1 }
   0xe   :  { %83 = vperm.xlu1 %2918, %v77_v8   ;;  %v35_v8 = vsub.f32 255.0, %v31_v2  ;;  %v3226_v15 = vand.u32 4294901760, %v3221_v6 }
   0xf   :  { %88 = vperm.xlu0 %2917, %v78_v7  }
  0x12   :  { %249 = vperm.xlu1 %2918, %v235_v10   ;;  %v262_v10 = vsel %vm257_vm0, %v230_v4, 0 }
  0x13   :  { %254 = vperm.xlu0 %2917, %v236_v9   ;;  %v3228_v16 = vand.u32 4294901760, %v262_v10 }
  0x16   :  { %239 = vperm.xlu1 %2918, %v233_v12  }
  0x17   :  { %244 = vperm.xlu0 %2917, %v234_v11  }
  0x1b   :  { %1766 = vperm.xlu0 %2917, %v1763_v13  }
  0x7d   :  { %v3148_v22 = vpop.permute.xlu1 %98 }
  0x7e   :  { %v3150_v23 = vpop.permute.xlu0 %58 }
  0x7f   :  { %v73_v24 = vmul.f32 %v3150_v23, %v33_v20  ;;  %v74_v25 = vmul.f32 %v3150_v23, %v34_v21  ;;  %v76_v61 = vmul.f32 %v3150_v23, %v3202_v54  ;;  %v75_v18 = vmul.f32 %v3150_v23, %v35_v8 }
  0x81   :  { %v3155_v26 = vadd.f32 %v3148_v22, %v73_v24  ;;  %v3158_v27 = vadd.f32 %v3148_v22, %v74_v25  ;;  %v3162_v29 = vpop.permute.xlu1 %48  ;;  %v3215_v3 = vadd.f32 %v3148_v22, %v76_v61  ;;  %v3241_v23 = vadd.f32 %v3148_v22, %v75_v18 }
  0x82   :  { %v3160_v28 = vpop.permute.xlu0 %53  ;;  %v65_v39 = vmul.f32 %v3162_v29, %v33_v20  ;;  %v66_v40 = vmul.f32 %v3162_v29, %v34_v21 }
  0x83   :  { %v2894_v30 = vmul.f32 -1.442695, %v3155_v26  ;;  %v2895_v31 = vmul.f32 -1.442695, %v3158_v27  ;;  %v69_v32 = vmul.f32 %v3160_v28, %v33_v20  ;;  %v70_v33 = vmul.f32 %v3160_v28, %v34_v21 }
  0x84   :  { %v2897_v11 = vmul.f32 -1.442695, %v3215_v3  ;;  %v71_v25 = vmul.f32 %v3160_v28, %v35_v8  ;;  %v2896_v55 = vmul.f32 -1.442695, %v3241_v23 }
  0x85   :  { %2919 = vpow2.f32 %v2894_v30  ;;  %v3170_v36 = vpop.permute.xlu1 %43  ;;  %v346_v30 = vsub.f32 %v3221_v6, %v3226_v15 }
  0x86   :  { %2921 = vpow2.f32 %v2895_v31  ;;  %v3168_v35 = vpop.permute.xlu0 %93  ;;  %v61_v44 = vmul.f32 %v3170_v36, %v33_v20  ;;  %v62_v45 = vmul.f32 %v3170_v36, %v34_v21  ;;  %v231_v21 = vld [vmem:[%s4028_s2 + $0x10] sm:$0xff]  ;;  %v3238_v31 = vsub.f32 %v262_v10, %v3228_v16 }
  0x87   :  { %v3173_v37 = vadd.f32 %v3168_v35, %v69_v32  ;;  %v3176_v38 = vadd.f32 %v3168_v35, %v70_v33  ;;  %v72_v33 = vmul.f32 %v3160_v28, %v3202_v54 }
  0x89   :  { %v2890_v41 = vmul.f32 -1.442695, %v3173_v37  ;;  %v2891_v42 = vmul.f32 -1.442695, %v3176_v38  ;;  %v3186_v47 = vpop.permute.xlu1 %83 }
  0x8a   :  { %v3184_v46 = vpop.permute.xlu0 %88  ;;  %v3195_v50 = vadd.f32 %v3186_v47, %v61_v44  ;;  %v3198_v51 = vadd.f32 %v3186_v47, %v62_v45  ;;  %v68_v44 = vmul.f32 %v3162_v29, %v3202_v54  ;;  %v3252_v45 = vadd.f32 %v3168_v35, %v72_v33 }
  0x8b   :  { %2923 = vpow2.f32 %v2890_v41  ;;  %v3189_v48 = vadd.f32 %v3184_v46, %v65_v39  ;;  %v3192_v49 = vadd.f32 %v3184_v46, %v66_v40  ;;  %v3246_v40 = vadd.f32 %v3168_v35, %v71_v25 }
  0x8c   :  { %2925 = vpow2.f32 %v2891_v42  ;;  %v2882_v56 = vmul.f32 -1.442695, %v3195_v50  ;;  %v2883_v57 = vmul.f32 -1.442695, %v3198_v51  ;;  %v265_v42 = vsel %vm257_vm0, %v231_v21, 0 }
  0x8d   :  { %v2886_v52 = vmul.f32 -1.442695, %v3189_v48  ;;  %v2887_v53 = vmul.f32 -1.442695, %v3192_v49  ;;  %v2892_v58 = vmul.f32 -1.442695, %v3246_v40 }
  0x8f   :  { %2927 = vpow2.f32 %v2886_v52  ;;  %v3256_v52 = vand.u32 4294901760, %v346_v30 }
  0x90   :  { %2929 = vpow2.f32 %v2887_v53  ;;  %v3259_v53 = vand.u32 4294901760, %v3238_v31 }
  0x91   :  { %2931 = vpow2.f32 %v2882_v56  ;;  %v67_v56 = vmul.f32 %v3162_v29, %v35_v8 }
  0x92   :  { %v2920_v60 = vpop.eup %2919  ;;  %2933 = vpow2.f32 %v2883_v57  ;;  %v3264_v57 = vadd.f32 %v3184_v46, %v68_v44 }
  0x93   :  { %v2922_v62 = vpop.eup %2921  ;;  %v177_v63 = vadd.f32 1.0, %v2920_v60  ;;  %v2893_v60 = vmul.f32 -1.442695, %v3252_v45  ;;  %v3276_v61 = vadd.f32 %v3184_v46, %v67_v56 }
  0x94   :  { %v178_v0 = vadd.f32 1.0, %v2922_v62  ;;  %v3281_v62 = vand.u32 4294901760, %v265_v42 }
  0x95   :  { %2935 = vrcp.f32 %v177_v63  ;;  %v232_v63 = vld [vmem:[%s4028_s2 + $0x18] sm:$0xff] }
  0x96   :  { %2937 = vrcp.f32 %v178_v0  ;;  %v268_v10 = vsel %vm257_vm0, %v232_v63, 0 }
  0x98   :  { %v2924_v5 = vpop.eup %2923 }
  0x99   :  { %v2926_v7 = vpop.eup %2925  ;;  %v173_v9 = vadd.f32 1.0, %v2924_v5 }
  0x9a   :  { %v174_v12 = vadd.f32 1.0, %v2926_v7  ;;  %v2889_v7 = vmul.f32 -1.442695, %v3264_v57 }
  0x9b   :  { %2939 = vrcp.f32 %v173_v9 }
  0x9c   :  { %v2928_v13 = vpop.eup %2927  ;;  %2941 = vrcp.f32 %v174_v12  ;;  %v2888_v12 = vmul.f32 -1.442695, %v3276_v61 }
  0x9d   :  { %v2930_v17 = vpop.eup %2929  ;;  %v169_v19 = vadd.f32 1.0, %v2928_v13  ;;  %2943 = vpow2.f32 %v2897_v11 }
  0x9e   :  { %v170_v20 = vadd.f32 1.0, %v2930_v17  ;;  %v2932_v24 = vpop.eup %2931 }
  0x9f   :  { %2945 = vrcp.f32 %v169_v19  ;;  %v2934_v32 = vpop.eup %2933  ;;  %v165_v34 = vadd.f32 1.0, %v2932_v24 }
  0xa0   :  { %2947 = vrcp.f32 %v170_v20  ;;  %v166_v41 = vadd.f32 1.0, %v2934_v32 }
  0xa1   :  { %2949 = vrcp.f32 %v165_v34 }
  0xa2   :  { %v2936_v39 = vpop.eup %2935  ;;  %2951 = vrcp.f32 %v166_v41 }
  0xa3   :  { %v2938_v43 = vpop.eup %2937  ;;  %v225_v22 = vmul.f32 %v2936_v39, %v3155_v26  ;;  %v63_v26 = vmul.f32 %v3170_v36, %v35_v8  ;;  %2953 = vpow2.f32 %v2896_v55  ;;  %v3328_v39 = vsub.f32 %v265_v42, %v3281_v62 }
  0xa4   :  { %v226_v28 = vmul.f32 %v2938_v43, %v3158_v27  ;;  %v64_v27 = vmul.f32 %v3170_v36, %v3202_v54  ;;  %v357_v54 = vsub.f32 %v3238_v31, %v3259_v53  ;;  %2955 = vpow2.f32 %v2892_v58 }
  0xa5   :  { %v3266_v35 = vand.u32 4294901760, %v225_v22  ;;  %v3287_v2 = vadd.f32 %v3186_v47, %v63_v26  ;;  %2957 = vpow2.f32 %v2893_v60  ;;  %v3334_v43 = vand.u32 4294901760, %v268_v10 }
  0xa6   :  { %v3272_v59 = vand.u32 4294901760, %v226_v28  ;;  %v3290_v36 = vadd.f32 %v3186_v47, %v64_v27  ;;  %2959 = vpow2.f32 %v2889_v7 }
  0xa7   :  { %v3279_v29 = vsub.f32 %v225_v22, %v3266_v35  ;;  %v2884_v18 = vmul.f32 -1.442695, %v3287_v2  ;;  %2961 = vpow2.f32 %v2888_v12 }
  0xa8   :  { %v2940_v0 = vpop.eup %2939  ;;  %295 = vmatprep.subr.mxu0 %v3272_v59  ;;  %v3294_v46 = vsub.f32 %v226_v28, %v3272_v59  ;;  %v2885_v19 = vmul.f32 -1.442695, %v3290_v36 }
  0xa9   :  { %v2942_v4 = vpop.eup %2941  ;;  %v221_v5 = vmul.f32 %v2940_v0, %v3173_v37  ;;  %297 = vmatpush1.msra.mxu0 %v3266_v35  ;;  %v419_v8 = vand.u32 4294901760, %v3279_v29 }
  0xaa   :  { %v222_v47 = vmul.f32 %v2942_v4, %v3176_v38  ;;  %v413_v9 = vand.u32 4294901760, %v3294_v46  ;;  %v2944_v11 = vpop.eup %2943  ;;  %2963 = vpow2.f32 %v2885_v19  ;;  %v3384_v19 = vand.u32 4294901760, %v357_v54 }
  0xab   :  { %v3306_v13 = vand.u32 4294901760, %v221_v5  ;;  %v420_v37 = vsub.f32 %v3279_v29, %v419_v8  ;;  %2965 = vpow2.f32 %v2884_v18 }
  0xac   :  { %v2946_v17 = vpop.eup %2945  ;;  %v3313_v38 = vand.u32 4294901760, %v222_v47  ;;  %v414_v20 = vsub.f32 %v3294_v46, %v413_v9 }
  0xad   :  { %v2948_v21 = vpop.eup %2947  ;;  %v217_v24 = vmul.f32 %v2946_v17, %v3189_v48  ;;  %v421_v25 = vand.u32 4294901760, %v420_v37  ;;  %v3320_v30 = vsub.f32 %v221_v5, %v3306_v13 }
  0xae   :  { %v218_v32 = vmul.f32 %v2948_v21, %v3192_v49  ;;  %299 = vmatprep.subr.mxu0 %v3313_v38  ;;  %v415_v33 = vand.u32 4294901760, %v414_v20  ;;  %v3325_v34 = vsub.f32 %v222_v47, %v3313_v38  ;;  %v2950_v44 = vpop.eup %2949  ;;  %v180_v49 = vadd.f32 1.0, %v2944_v11 }
  0xaf   :  { %301 = vmatpush1.msra.mxu0 %v3306_v13  ;;  %v3331_v41 = vand.u32 4294901760, %v217_v24  ;;  %v431_v48 = vand.u32 4294901760, %v3320_v30  ;;  %v2952_v55 = vpop.eup %2951  ;;  %v213_v42 = vmul.f32 %v2950_v44, %v3195_v50  ;;  %v3355_v50 = vand.u32 4294901760, %v3328_v39 }
  0xb0   :  { %416 = vmatprep.subr.mxu1 %v415_v33  ;;  %v3336_v22 = vand.u32 4294901760, %v218_v32  ;;  %v425_v28 = vand.u32 4294901760, %v3325_v34  ;;  %v214_v26 = vmul.f32 %v2952_v55, %v3198_v51  ;;  %v3362_v51 = vsub.f32 %v268_v10, %v3334_v43  ;;  %v2954_v37 = vpop.eup %2953 }
  0xb1   :  { %422 = vmatpush1.msra.mxu1 %v421_v25  ;;  %v432_v56 = vsub.f32 %v3320_v30, %v431_v48  ;;  %v3344_v58 = vsub.f32 %v217_v24, %v3331_v41  ;;  %v3358_v63 = vand.u32 4294901760, %v213_v42  ;;  %2967 = vrcp.f32 %v180_v49  ;;  %v2956_v18 = vpop.eup %2955 }
  0xb2   :  { %303 = vmatprep.subr.mxu0 %v3336_v22  ;;  %v426_v27 = vsub.f32 %v3325_v34, %v425_v28  ;;  %v3352_v60 = vsub.f32 %v218_v32, %v3336_v22  ;;  %v3364_v5 = vand.u32 4294901760, %v214_v26  ;;  %v2958_v24 = vpop.eup %2957  ;;  %v368_v33 = vsub.f32 %v3328_v39, %v3355_v50 }
  0xb3   :  { %305 = vmatpush1.msra.mxu0 %v3331_v41  ;;  %v433_v0 = vand.u32 4294901760, %v432_v56  ;;  %v443_v4 = vand.u32 4294901760, %v3344_v58  ;;  %v3371_v12 = vsub.f32 %v213_v42, %v3358_v63  ;;  %v3393_v44 = vand.u32 4294901760, %v3362_v51  ;;  %v2960_v49 = vpop.eup %2959 }
  0xb4   :  { %v427_v7 = vand.u32 4294901760, %v426_v27  ;;  %v437_v47 = vand.u32 4294901760, %v3352_v60  ;;  %307 = vmatprep.subr.mxu0 %v3364_v5  ;;  %v3378_v17 = vsub.f32 %v214_v26, %v3364_v5  ;;  %v179_v55 = vadd.f32 1.0, %v2954_v37  ;;  %v2962_v26 = vpop.eup %2961 }
  0xb5   :  { %v444_v11 = vsub.f32 %v3344_v58, %v443_v4  ;;  %309 = vmatpush1.msra.mxu0 %v3358_v63  ;;  %v455_v21 = vand.u32 4294901760, %v3371_v12  ;;  %v176_v56 = vadd.f32 1.0, %v2958_v24  ;;  %v175_v27 = vadd.f32 1.0, %v2956_v18 }
  0xb6   :  { %428 = vmatprep.subr.mxu1 %v427_v7  ;;  %v438_v10 = vsub.f32 %v3352_v60, %v437_v47  ;;  %348 = vmatmul.mubr.f32.vlgmr.msra.gmra.mxu0 %v3256_v52  ;;  %v449_v32 = vand.u32 4294901760, %v3378_v17  ;;  %v3407_v7 = vand.u32 4294901760, %v368_v33  ;;  %2969 = vrcp.f32 %v179_v55 }
  0xb7   :  { %434 = vmatpush1.msra.mxu1 %v433_v0  ;;  %v445_v20 = vand.u32 4294901760, %v444_v11  ;;  %546 = vmatprep.subr.mxu0 %v3294_v46  ;;  %v456_v54 = vsub.f32 %v3371_v12, %v455_v21  ;;  %v379_v11 = vsub.f32 %v3362_v51, %v3393_v44  ;;  %v2964_v37 = vpop.eup %2963  ;;  %2971 = vrcp.f32 %v176_v56 }
  0xb8   :  { %v439_v25 = vand.u32 4294901760, %v438_v10  ;;  %549 = vmatpush1.msra.mxu0 %v3279_v29  ;;  %353 = vmatprep.mubr.f32.mxu0 %v3070_v14  ;;  %v450_v42 = vsub.f32 %v3378_v17, %v449_v32  ;;  %v172_v10 = vadd.f32 1.0, %v2960_v49  ;;  %v171_v18 = vadd.f32 1.0, %v2962_v26 }
  0xb9   :  { %552 = vmatprep.subr.mxu0 %v3325_v34  ;;  %v457_v24 = vand.u32 4294901760, %v456_v54  ;;  %2973 = vrcp.f32 %v175_v27  ;;  %v3417_v33 = vand.u32 4294901760, %v379_v11 }
  0xba   :  { %440 = vmatprep.subr.mxu1 %v439_v25  ;;  %555 = vmatpush1.msra.mxu0 %v3320_v30  ;;  %v451_v0 = vand.u32 4294901760, %v450_v42  ;;  %v168_v25 = vadd.f32 1.0, %v2964_v37  ;;  %2975 = vrcp.f32 %v172_v10 }
  0xbb   :  { %446 = vmatpush1.msra.mxu1 %v445_v20  ;;  %359 = vmatmul.mubr.f32.gmra.mxu0 %v3384_v19  ;;  %v2966_v20 = vpop.eup %2965  ;;  %2977 = vrcp.f32 %v171_v18 }
  0xbc   :  { %558 = vmatprep.subr.mxu0 %v3352_v60  ;;  %364 = vmatprep.mubr.f32.mxu0 %v3070_v14  ;;  %v167_v54 = vadd.f32 1.0, %v2966_v20  ;;  %2979 = vrcp.f32 %v168_v25 }
  0xbd   :  { %561 = vmatpush1.msra.mxu0 %v3344_v58  ;;  %452 = vmatprep.subr.mxu1 %v451_v0 }
  0xbe   :  { %564 = vmatprep.subr.mxu0 %v3378_v17  ;;  %458 = vmatpush1.msra.mxu1 %v457_v24  ;;  %v2968_v49 = vpop.eup %2967  ;;  %2981 = vrcp.f32 %v167_v54 }
  0xbf   :  { %567 = vmatpush1.msra.mxu0 %v3371_v12  ;;  %493 = vmatmul.mubr.f32.vlgmr.msra.gmra.mxu1 %v3212_v1  ;;  %v228_v55 = vmul.f32 %v2968_v49, %v3215_v3 }
  0xc0   :  { %370 = vmatmul.mubr.f32.gmra.mxu0 %v3407_v7  ;;  %658 = vmatprep.subr.mxu1 %v3272_v59 }
  0xc1   :  { %769 = vmatprep.subr.mxu0 %v413_v9  ;;  %660 = vmatpush1.msra.mxu1 %v3266_v35  ;;  %v3437_v46 = vand.u32 4294901760, %v228_v55 }
  0xc2   :  { %375 = vmatprep.mubr.f32.mxu0 %v3070_v14  ;;  %662 = vmatprep.subr.mxu1 %v3313_v38 }
  0xc3   :  { %498 = vmatprep.mubr.f32.mxu1 %v3070_v14  ;;  %664 = vmatpush1.msra.mxu1 %v3306_v13  ;;  %v2970_v3 = vpop.eup %2969  ;;  %v3452_v29 = vsub.f32 %v228_v55, %v3437_v46 }
  0xc4   :  { %381 = vmatmul.mubr.f32.gmra.mxu0 %v3417_v33  ;;  %500 = vmatmul.mubr.f32.gmra.mxu1 %v3228_v16  ;;  %v2972_v9 = vpop.eup %2971  ;;  %v227_v30 = vmul.f32 %v2970_v3, %v3241_v23 }
  0xc5   :  { %666 = vmatprep.subr.mxu1 %v3336_v22  ;;  %505 = vmatprep.mubr.f32.mxu1 %v3070_v14  ;;  %v224_v34 = vmul.f32 %v2972_v9, %v3252_v45  ;;  %v1103_v58 = vand.u32 4294901760, %v3452_v29 }
  0xc6   :  { %668 = vmatpush1.msra.mxu1 %v3331_v41  ;;  %600 = vmatprep.mubr.f32.mxu0 %v3070_v14  ;;  %v3473_v45 = vand.u32 4294901760, %v227_v30 }
  0xc7   :  { %670 = vmatprep.subr.mxu1 %v3364_v5  ;;  %v1104_v12 = vsub.f32 %v3452_v29, %v1103_v58 }
  0xc8   :  { %672 = vmatpush1.msra.mxu1 %v3358_v63  ;;  %603 = vmatmul.mubr.f32.vlgmr.msra.gmra.mxu0 %v3221_v6 }
  0xc9   :  { %507 = vmatmul.mubr.f32.gmra.mxu1 %v3281_v62  ;;  %773 = vmatpush1.msra.mxu0 %v419_v8  ;;  %v2974_v8 = vpop.eup %2973 }
  0xca   :  { %884 = vmatprep.subr.mxu1 %v3272_v59  ;;  %777 = vmatprep.subr.mxu0 %v425_v28  ;;  %v2976_v59 = vpop.eup %2975  ;;  %v223_v28 = vmul.f32 %v2974_v8, %v3246_v40 }
  0xcb   :  { %781 = vmatpush1.msra.mxu0 %v431_v48  ;;  %512 = vmatprep.mubr.f32.mxu1 %v3070_v14  ;;  %v2978_v48 = vpop.eup %2977 }
  0xcc   :  { %608 = vmatprep.mubr.f32.mxu0 %v3070_v14  ;;  %785 = vmatprep.subr.mxu0 %v437_v47  ;;  %v2980_v60 = vpop.eup %2979  ;;  %v219_v40 = vmul.f32 %v2978_v48, %v3276_v61  ;;  %v3478_v47 = vand.u32 4294901760, %v224_v34  ;;  %v3485_v17 = vand.u32 4294901760, %v223_v28  ;;  %v3495_v61 = vsub.f32 %v227_v30, %v3473_v45 }
  0xcd   :  { %514 = vmatmul.mubr.f32.gmra.mxu1 %v3334_v43  ;;  %611 = vmatmul.mubr.f32.gmra.mxu0 %v3238_v31  ;;  %v2982_v23 = vpop.eup %2981 }
  0xce   :  { %789 = vmatpush1.msra.mxu0 %v443_v4  ;;  %616 = vmatprep.mubr.f32.mxu0 %v3070_v14  ;;  %v220_v4 = vmul.f32 %v2976_v59, %v3264_v57  ;;  %v216_v57 = vmul.f32 %v2980_v60, %v3290_v36  ;;  %v3499_v36 = vand.u32 4294901760, %v219_v40 }
  0xcf   :  { %793 = vmatprep.subr.mxu0 %v449_v32  ;;  %705 = vmatprep.mubr.f32.mxu1 %v3070_v14 }
  0xd0   :  { %797 = vmatpush1.msra.mxu0 %v455_v21  ;;  %v215_v21 = vmul.f32 %v2982_v23, %v3287_v2  ;;  %v3502_v2 = vsub.f32 %v224_v34, %v3478_v47 }
  0xd1   :  { %985 = vmatprep.subr.mxu0 %v3437_v46  ;;  %619 = vmatmul.mubr.f32.gmra.mxu0 %v3328_v39 }
  0xd2   :  { %709 = vmatmul.mubr.f32.vlgmr.msra.gmra.mxu1 %v3226_v15  ;;  %624 = vmatprep.mubr.f32.mxu0 %v3070_v14  ;;  %v1115_v42 = vand.u32 4294901760, %v3502_v2 }
  0xd3   :  { %886 = vmatpush1.msra.mxu1 %v3266_v35  ;;  %714 = vmatprep.mubr.f32.mxu1 %v3070_v14  ;;  %v3490_v35 = vand.u32 4294901760, %v220_v4 }
  0xd4   :  { %888 = vmatprep.subr.mxu1 %v3313_v38  ;;  %v3506_v38 = vand.u32 4294901760, %v216_v57  ;;  %v1116_v37 = vsub.f32 %v3502_v2, %v1115_v42 }
  0xd5   :  { %890 = vmatpush1.msra.mxu1 %v3306_v13  ;;  %627 = vmatmul.mubr.f32.gmra.mxu0 %v3362_v51  ;;  %v1105_v13 = vand.u32 4294901760, %v1104_v12  ;;  %v3516_v32 = vsub.f32 %v220_v4, %v3490_v35  ;;  %v3673_v4 = vpop.permute.xlu1 %249  ;;  %v3675_v12 = vpop.permute.xlu0 %254 }
  0xd6   :  { %892 = vmatprep.subr.mxu1 %v3336_v22  ;;  %718 = vmatmul.mubr.f32.gmra.mxu1 %v3259_v53  ;;  %v3509_v22 = vsub.f32 %v223_v28, %v3485_v17  ;;  %v3530_v26 = vsub.f32 %v216_v57, %v3506_v38  ;;  %v1117_v54 = vand.u32 4294901760, %v1116_v37 }
  0xd7   :  { %894 = vmatpush1.msra.mxu1 %v3331_v41  ;;  %723 = vmatprep.mubr.f32.mxu1 %v3070_v14  ;;  %v3513_v41 = vand.u32 4294901760, %v215_v21  ;;  %v1127_v27 = vand.u32 4294901760, %v3516_v32 }
  0xd8   :  { %896 = vmatprep.subr.mxu1 %v3364_v5  ;;  %830 = vmatprep.mubr.f32.mxu0 %v3070_v14  ;;  %v1109_v5 = vand.u32 4294901760, %v3495_v61  ;;  %v1121_v56 = vand.u32 4294901760, %v3509_v22  ;;  %v1139_v20 = vand.u32 4294901760, %v3530_v26 }
  0xd9   :  { %898 = vmatpush1.msra.mxu1 %v3358_v63  ;;  %832 = vmatmul.mubr.f32.vlgmr.msra.gmra.mxu0 %v3212_v1  ;;  %v3524_v63 = vsub.f32 %v219_v40, %v3499_v36  ;;  %v3535_v0 = vsub.f32 %v215_v21, %v3513_v41  ;;  %v1128_v18 = vsub.f32 %v3516_v32, %v1127_v27  ;;  %v3679_v21 = vpop.permute.xlu1 %239 }
  0xda   :  { %1106 = vmatprep.subr.mxu1 %v1105_v13  ;;  %727 = vmatmul.mubr.f32.gmra.mxu1 %v3355_v50  ;;  %v1110_v11 = vsub.f32 %v3495_v61, %v1109_v5  ;;  %v1122_v24 = vsub.f32 %v3509_v22, %v1121_v56  ;;  %v1140_v9 = vsub.f32 %v3530_v26, %v1139_v20 }
  0xdb   :  { %987 = vmatpush1.msra.mxu0 %v3473_v45  ;;  %732 = vmatprep.mubr.f32.mxu1 %v3070_v14  ;;  %v1133_v10 = vand.u32 4294901760, %v3524_v63  ;;  %v1145_v25 = vand.u32 4294901760, %v3535_v0  ;;  %v1129_v8 = vand.u32 4294901760, %v1128_v18 }
  0xdc   :  { %989 = vmatprep.subr.mxu0 %v3478_v47  ;;  %837 = vmatprep.mubr.f32.mxu0 %v3070_v14  ;;  %v1111_v49 = vand.u32 4294901760, %v1110_v11  ;;  %v1123_v3 = vand.u32 4294901760, %v1122_v24  ;;  %v1141_v34 = vand.u32 4294901760, %v1140_v9 }
  0xdd   :  { %991 = vmatpush1.msra.mxu0 %v3485_v17  ;;  %v1134_v55 = vsub.f32 %v3524_v63, %v1133_v10  ;;  %v1146_v59 = vsub.f32 %v3535_v0, %v1145_v25 }
  0xde   :  { %993 = vmatprep.subr.mxu0 %v3490_v35  ;;  %736 = vmatmul.mubr.f32.gmra.mxu1 %v3393_v44 }
  0xdf   :  { %839 = vmatmul.mubr.f32.gmra.mxu0 %v3228_v16  ;;  %931 = vmatprep.mubr.f32.mxu1 %v3070_v14  ;;  %v1135_v30 = vand.u32 4294901760, %v1134_v55  ;;  %v1147_v48 = vand.u32 4294901760, %v1146_v59 }
  0xe0   :  { %995 = vmatpush1.msra.mxu0 %v3499_v36  ;;  %844 = vmatprep.mubr.f32.mxu0 %v3070_v14 }
  0xe1   :  { %997 = vmatprep.subr.mxu0 %v3506_v38 }
  0xe2   :  { %999 = vmatpush1.msra.mxu0 %v3513_v41  ;;  %933 = vmatmul.mubr.f32.vlgmr.msra.gmra.mxu1 %v3212_v1 }
  0xe3   :  { %1236 = vmatprep.subr.mxu0 %v3452_v29  ;;  %846 = vmatmul.mubr.f32.gmra.mxu0 %v3281_v62 }
  0xe4   :  { %1112 = vmatpush1.msra.mxu1 %v1111_v49  ;;  %851 = vmatprep.mubr.f32.mxu0 %v3070_v14 }
  0xe5   :  { %1118 = vmatprep.subr.mxu1 %v1117_v54  ;;  %938 = vmatprep.mubr.f32.mxu1 %v3070_v14 }
  0xe6   :  { %1124 = vmatpush1.msra.mxu1 %v1123_v3 }
  0xe7   :  { %1130 = vmatprep.subr.mxu1 %v1129_v8  ;;  %853 = vmatmul.mubr.f32.gmra.mxu0 %v3334_v43 }
  0xe8   :  { %940 = vmatmul.mubr.f32.gmra.mxu1 %v3228_v16  ;;  %1032 = vmatprep.mubr.f32.mxu0 %v3070_v14 }
  0xe9   :  { %1136 = vmatpush1.msra.mxu1 %v1135_v30  ;;  %945 = vmatprep.mubr.f32.mxu1 %v3070_v14 }
  0xea   :  { %1142 = vmatprep.subr.mxu1 %v1141_v34 }
  0xeb   :  { %1148 = vmatpush1.msra.mxu1 %v1147_v48  ;;  %1038 = vmatmul.mubr.f32.vlgmr.msra.gmra.mxu0 %v3256_v52 }
  0xec   :  { %1348 = vmatprep.subr.mxu1 %v3437_v46  ;;  %947 = vmatmul.mubr.f32.gmra.mxu1 %v3281_v62 }
  0xed   :  { %1239 = vmatpush1.msra.mxu0 %v3495_v61  ;;  %952 = vmatprep.mubr.f32.mxu1 %v3070_v14 }
  0xee   :  { %1242 = vmatprep.subr.mxu0 %v3502_v2  ;;  %1043 = vmatprep.mubr.f32.mxu0 %v3070_v14 }
  0xef   :  { %1245 = vmatpush1.msra.mxu0 %v3509_v22 }
  0xf0   :  { %1248 = vmatprep.subr.mxu0 %v3516_v32  ;;  %954 = vmatmul.mubr.f32.gmra.mxu1 %v3334_v43 }
  0xf1   :  { %1049 = vmatmul.mubr.f32.gmra.mxu0 %v3384_v19  ;;  %1181 = vmatprep.mubr.f32.mxu1 %v3070_v14 }
  0xf2   :  { %1251 = vmatpush1.msra.mxu0 %v3524_v63  ;;  %1054 = vmatprep.mubr.f32.mxu0 %v3070_v14 }
  0xf3   :  { %1254 = vmatprep.subr.mxu0 %v3530_v26 }
  0xf4   :  { %1257 = vmatpush1.msra.mxu0 %v3535_v0  ;;  %1183 = vmatmul.mubr.f32.vlgmr.msra.gmra.mxu1 %v3212_v1 }
  0xf5   :  { %1459 = vmatprep.subr.mxu0 %v1103_v58  ;;  %1060 = vmatmul.mubr.f32.gmra.mxu0 %v3407_v7 }
  0xf6   :  { %1350 = vmatpush1.msra.mxu1 %v3473_v45  ;;  %1065 = vmatprep.mubr.f32.mxu0 %v3070_v14 }
  0xf7   :  { %1352 = vmatprep.subr.mxu1 %v3478_v47  ;;  %1188 = vmatprep.mubr.f32.mxu1 %v3070_v14 }
  0xf8   :  { %1354 = vmatpush1.msra.mxu1 %v3485_v17 }
  0xf9   :  { %1356 = vmatprep.subr.mxu1 %v3490_v35  ;;  %1071 = vmatmul.mubr.f32.gmra.mxu0 %v3417_v33 }
  0xfa   :  { %1190 = vmatmul.mubr.f32.gmra.mxu1 %v3228_v16  ;;  %1290 = vmatprep.mubr.f32.mxu0 %v3070_v14 }
  0xfb   :  { %1358 = vmatpush1.msra.mxu1 %v3499_v36  ;;  %1195 = vmatprep.mubr.f32.mxu1 %v3070_v14 }
  0xfc   :  { %1360 = vmatprep.subr.mxu1 %v3506_v38 }
  0xfd   :  { %1362 = vmatpush1.msra.mxu1 %v3513_v41  ;;  %1293 = vmatmul.mubr.f32.vlgmr.msra.gmra.mxu0 %v3221_v6 }
  0xfe   :  { %1574 = vmatprep.subr.mxu1 %v3437_v46  ;;  %1197 = vmatmul.mubr.f32.gmra.mxu1 %v3281_v62 }
  0xff   :  { %1463 = vmatpush1.msra.mxu0 %v1109_v5  ;;  %1202 = vmatprep.mubr.f32.mxu1 %v3070_v14 }
 0x100   :  { %1467 = vmatprep.subr.mxu0 %v1115_v42  ;;  %1298 = vmatprep.mubr.f32.mxu0 %v3070_v14  ;;  %v3683_v42 = vpop.permute.xlu0 %244 }
 0x101   :  { %1471 = vmatpush1.msra.mxu0 %v1121_v56 }
 0x102   :  { %1475 = vmatprep.subr.mxu0 %v1127_v27  ;;  %1204 = vmatmul.mubr.f32.gmra.mxu1 %v3334_v43 }
 0x103   :  { %1301 = vmatmul.mubr.f32.gmra.mxu0 %v3238_v31  ;;  %1395 = vmatprep.mubr.f32.mxu1 %v3070_v14 }
 0x104   :  { %1479 = vmatpush1.msra.mxu0 %v1133_v10  ;;  %1306 = vmatprep.mubr.f32.mxu0 %v3070_v14 }
 0x105   :  { %1483 = vmatprep.subr.mxu0 %v1139_v20 }
 0x106   :  { %1487 = vmatpush1.msra.mxu0 %v1145_v25  ;;  %1399 = vmatmul.mubr.f32.vlgmr.msra.gmra.mxu1 %v3226_v15 }
 0x107   :  { %1309 = vmatmul.mubr.f32.gmra.mxu0 %v3328_v39  ;;  %1576 = vmatpush1.msra.mxu1 %v3473_v45 }
 0x108   :  { %1578 = vmatprep.subr.mxu1 %v3478_v47  ;;  %1314 = vmatprep.mubr.f32.mxu0 %v3070_v14 }
 0x109   :  { %1580 = vmatpush1.msra.mxu1 %v3485_v17  ;;  %1404 = vmatprep.mubr.f32.mxu1 %v3070_v14 }
 0x10a   :  { %1582 = vmatprep.subr.mxu1 %v3490_v35  ;;  %1408 = vmatmul.mubr.f32.gmra.mxu1 %v3259_v53 }
 0x10b   :  { %1317 = vmatmul.mubr.f32.gmra.mxu0 %v3362_v51  ;;  %1584 = vmatpush1.msra.mxu1 %v3499_v36 }
 0x10c   :  { %1586 = vmatprep.subr.mxu1 %v3506_v38  ;;  %1413 = vmatprep.mubr.f32.mxu1 %v3070_v14 }
 0x10d   :  { %1588 = vmatpush1.msra.mxu1 %v3513_v41  ;;  %1520 = vmatprep.mubr.f32.mxu0 %v3070_v14 }
 0x10e   :  { %1417 = vmatmul.mubr.f32.gmra.mxu1 %v3355_v50 }
 0x10f   :  { %1522 = vmatmul.mubr.f32.vlgmr.msra.gmra.mxu0 %v3212_v1  ;;  %1422 = vmatprep.mubr.f32.mxu1 %v3070_v14 }
 0x110   :  { %1527 = vmatprep.mubr.f32.mxu0 %v3070_v14 }
 0x112   :  { %1426 = vmatmul.mubr.f32.gmra.mxu1 %v3393_v44 }
 0x113   :  { %1529 = vmatmul.mubr.f32.gmra.mxu0 %v3228_v16  ;;  %1621 = vmatprep.mubr.f32.mxu1 %v3070_v14 }
 0x114   :  { %1534 = vmatprep.mubr.f32.mxu0 %v3070_v14 }
 0x116   :  { %1623 = vmatmul.mubr.f32.vlgmr.msra.gmra.mxu1 %v3212_v1 }
 0x117   :  { %1536 = vmatmul.mubr.f32.gmra.mxu0 %v3281_v62  ;;  %1628 = vmatprep.mubr.f32.mxu1 %v3070_v14 }
 0x118   :  { %1541 = vmatprep.mubr.f32.mxu0 %v3070_v14 }
 0x11a   :  { %1630 = vmatmul.mubr.f32.gmra.mxu1 %v3228_v16 }
 0x11b   :  { %1543 = vmatmul.mubr.f32.gmra.mxu0 %v3334_v43  ;;  %1635 = vmatprep.mubr.f32.mxu1 %v3070_v14 }
 0x11c   :  { %1844 = vmatprep.mubr.f32.mxu0 %v3070_v14 }
 0x11e   :  { %1637 = vmatmul.mubr.f32.gmra.mxu1 %v3281_v62 }
 0x11f   :  { %1642 = vmatprep.mubr.f32.mxu1 %v3070_v14 }
 0x122   :  { %1644 = vmatmul.mubr.f32.gmra.mxu1 %v3334_v43 }
 0x123   :  { %1960 = vmatprep.mubr.f32.mxu1 %v3070_v14 }
 0x176   :  { %v349_v1 = vpop.f32.mrf.mxu0 }
 0x177   :  { %v350_v61 = vadd.f32 %v349_v1, %v3679_v21 }
 0x178   :  { %v351_v6 = vpop.f32.mrf.mxu0 }
 0x179   :  { %v352_v13 = vadd.f32 %v351_v6, %v3679_v21 }
 0x17b   :  { %v360_v15 = vpop.f32.mrf.mxu0 }
 0x17c   :  { %v361_v56 = vadd.f32 %v360_v15, %v3683_v42 }
 0x17d   :  { %v362_v31 = vpop.f32.mrf.mxu0 }
 0x17e   :  { %v363_v37 = vadd.f32 %v362_v31, %v3683_v42 }
 0x17f   :  { %v494_v16 = vpop.f32.mrf.mxu1 }
 0x180   :  { %v371_v52 = vpop.f32.mrf.mxu0  ;;  %v495_v38 = vadd.f32 %v494_v16, %v350_v61 }
 0x181   :  { %v496_v39 = vpop.f32.mrf.mxu1  ;;  %v372_v25 = vadd.f32 %v371_v52, %v3673_v4 }
 0x182   :  { %v373_v53 = vpop.f32.mrf.mxu0  ;;  %v497_v32 = vadd.f32 %v496_v39, %v352_v13 }
 0x183   :  { %v374_v59 = vadd.f32 %v373_v53, %v3673_v4 }
 0x184   :  { %v382_v50 = vpop.f32.mrf.mxu0  ;;  %v501_v51 = vpop.f32.mrf.mxu1 }
 0x185   :  { %v502_v10 = vadd.f32 %v501_v51, %v361_v56  ;;  %v383_v52 = vadd.f32 %v382_v50, %v3675_v12 }
 0x186   :  { %v3669_v19 = vpop.f32.mrf.mxu0  ;;  %v503_v44 = vpop.f32.mrf.mxu1 }
 0x187   :  { %v504_v54 = vadd.f32 %v503_v44, %v363_v37  ;;  %v385_v53 = vadd.f32 %v3669_v19, %v3675_v12 }
 0x188   :  { %v604_v62 = vpop.f32.mrf.mxu0 }
 0x189   :  { %v508_v7 = vpop.f32.mrf.mxu1  ;;  %v605_v5 = vadd.f32 %v604_v62, %v495_v38 }
 0x18a   :  { %v606_v33 = vpop.f32.mrf.mxu0  ;;  %v509_v30 = vadd.f32 %v508_v7, %v372_v25 }
 0x18b   :  { %v510_v46 = vpop.f32.mrf.mxu1  ;;  %v607_v26 = vadd.f32 %v606_v33, %v497_v32 }
 0x18c   :  { %v511_v16 = vadd.f32 %v510_v46, %v374_v59 }
 0x18d   :  { %v515_v43 = vpop.f32.mrf.mxu1  ;;  %v612_v29 = vpop.f32.mrf.mxu0 }
 0x18e   :  { %v613_v55 = vadd.f32 %v612_v29, %v502_v10  ;;  %v516_v7 = vadd.f32 %v515_v43, %v383_v52 }
 0x18f   :  { %v3671_v28 = vpop.f32.mrf.mxu1  ;;  %v614_v58 = vpop.f32.mrf.mxu0 }
 0x190   :  { %v615_v48 = vadd.f32 %v614_v58, %v504_v54  ;;  %v518_v46 = vadd.f32 %v3671_v28, %v385_v53 }
 0x191   :  { %v620_v60 = vpop.f32.mrf.mxu0 }
 0x192   :  { %v710_v23 = vpop.f32.mrf.mxu1  ;;  %v621_v39 = vadd.f32 %v620_v60, %v509_v30 }
 0x193   :  { %v622_v45 = vpop.f32.mrf.mxu0  ;;  %v711_v27 = vadd.f32 %v710_v23, %v605_v5 }
 0x194   :  { %v712_v40 = vpop.f32.mrf.mxu1  ;;  %v623_v29 = vadd.f32 %v622_v45, %v511_v16 }
 0x195   :  { %v628_v47 = vpop.f32.mrf.mxu0  ;;  %v713_v24 = vadd.f32 %v712_v40, %v607_v26 }
 0x196   :  { %v719_v57 = vpop.f32.mrf.mxu1  ;;  %v629_v60 = vadd.f32 %v628_v47, %v516_v7 }
 0x197   :  { %v3677_v17 = vpop.f32.mrf.mxu0  ;;  %v720_v1 = vadd.f32 %v719_v57, %v613_v55 }
 0x198   :  { %v721_v35 = vpop.f32.mrf.mxu1  ;;  %v631_v43 = vadd.f32 %v3677_v17, %v518_v46 }
 0x199   :  { %v833_v36 = vpop.f32.mrf.mxu0  ;;  %v722_v51 = vadd.f32 %v721_v35, %v615_v48 }
 0x19a   :  { %v728_v2 = vpop.f32.mrf.mxu1  ;;  %v834_v20 = vadd.f32 %v833_v36, %v711_v27 }
 0x19b   :  { %v835_v22 = vpop.f32.mrf.mxu0  ;;  %v729_v23 = vadd.f32 %v728_v2, %v621_v39 }
 0x19c   :  { %v730_v41 = vpop.f32.mrf.mxu1  ;;  %v836_v3 = vadd.f32 %v835_v22, %v713_v24 }
 0x19d   :  { %v731_v61 = vadd.f32 %v730_v41, %v623_v29 }
 0x19e   :  { %v737_v63 = vpop.f32.mrf.mxu1 }
 0x19f   :  { %v840_v0 = vpop.f32.mrf.mxu0  ;;  %v738_v45 = vadd.f32 %v737_v63, %v629_v60 }
 0x1a0   :  { %v739_v11 = vpop.f32.mrf.mxu1  ;;  %v841_v44 = vadd.f32 %v840_v0, %v720_v1 }
 0x1a1   :  { %v842_v18 = vpop.f32.mrf.mxu0  ;;  %v740_v47 = vadd.f32 %v739_v11, %v631_v43 }
 0x1a2   :  { %v934_v49 = vpop.f32.mrf.mxu1  ;;  %v843_v40 = vadd.f32 %v842_v18, %v722_v51 }
 0x1a3   :  { %v847_v9 = vpop.f32.mrf.mxu0  ;;  %v3688_v8 = vadd.f32 %v934_v49, %v834_v20 }
 0x1a4   :  { %v936_v34 = vpop.f32.mrf.mxu1  ;;  %v848_v36 = vadd.f32 %v847_v9, %v729_v23  ;;  %v1762_v9 = vld [vmem:[%s4030_s4] sm:$0xf]  ;;  %s3071_s4 = smov [#allocation2]  }
 0x1a5   :  { %v2898_v6 = vmul.f32 -1.442695, %v3688_v8  ;;  %v849_v15 = vpop.f32.mrf.mxu0  ;;  %v3692_v31 = vadd.f32 %v936_v34, %v836_v3  ;;  %v1770_v1 = vsel %vm257_vm0, %v1762_v9, 0  ;;  %s2874_s28 = sshll.u32 %s3071_s4, 4  ;;  %s2875_s28 = int_to_ptr.vmem [resolvable:$true] %s2874_s28 }
 0x1a6   :  { %v850_v22 = vadd.f32 %v849_v15, %v731_v61  ;;  %v3736_v51 = vand.u32 4294901760, %v1770_v1  ;;  %s3047_s29 = scalar_lea.vmem %s2875_s28, 256  ;;  %p3052_p1 = scmp.lt.s32.totalorder %s2875_s28, %s2875_s28 }
 0x1a7   :  { %2983 = vpow2.f32 %v2898_v6  ;;  %v2899_v62 = vmul.f32 -1.442695, %v3692_v31  ;;  %v854_v33 = vpop.f32.mrf.mxu0  ;;  %p3048_p0 = scmp.ne.s32.totalorder %s2875_s28, %s3047_s29  ;;  %p3053_p2 = scmp.lt.s32.totalorder %s3047_s29, %s3047_s29 }
 0x1a8   :  { %v941_v58 = vpop.f32.mrf.mxu1  ;;  %v855_v56 = vadd.f32 %v854_v33, %v738_v45 }
 0x1a9   :  { %2985 = vpow2.f32 %v2899_v62  ;;  %v3698_v57 = vadd.f32 %v941_v58, %v841_v44  ;;  %v856_v50 = vpop.f32.mrf.mxu0  ;;  %p3054_p3 = por %p3053_p2, %p3052_p1 }
 0x1aa   :  { %v943_v35 = vpop.f32.mrf.mxu1  ;;  %v857_v17 = vadd.f32 %v856_v50, %v740_v47 }
 0x1ab   :  { %v2902_v13 = vmul.f32 -1.442695, %v3698_v57  ;;  %v3702_v38 = vadd.f32 %v943_v35, %v843_v40  ;;  %v3704_v19 = vpop.f32.mrf.mxu0  ;;  %v3739_v40 = vsub.f32 %v1770_v1, %v3736_v51  ;;  %p3055_p4 = pnand %p3054_p3, %p3048_p0 }
 0x1ac   :  { %v948_v2 = vpop.f32.mrf.mxu1 }
 0x1ad   :  { %2987 = vpow2.f32 %v2902_v13  ;;  %v2903_v32 = vmul.f32 -1.442695, %v3702_v38  ;;  %v3708_v5 = vadd.f32 %v948_v2, %v848_v36  ;;  %v3710_v28 = vpop.f32.mrf.mxu0  ;;  %v3742_v43 = vand.u32 4294901760, %v3739_v40 }
 0x1ae   :  { %v950_v41 = vpop.f32.mrf.mxu1  ;;  %v1042_v9 = vadd.f32 %v3710_v28, %v3679_v21 }
 0x1af   :  { %2989 = vpow2.f32 %v2903_v32  ;;  %v2906_v26 = vmul.f32 -1.442695, %v3708_v5  ;;  %v3713_v27 = vadd.f32 %v950_v41, %v850_v22 }
 0x1b0   :  { %v955_v0 = vpop.f32.mrf.mxu1 }
 0x1b1   :  { %2991 = vpow2.f32 %v2906_v26  ;;  %v2907_v63 = vmul.f32 -1.442695, %v3713_v27  ;;  %v3716_v37 = vadd.f32 %v955_v0, %v855_v56  ;;  %v3718_v10 = vpop.f32.mrf.mxu0  ;;  %v1848_v0 = vsub.f32 %v3739_v40, %v3742_v43 }
 0x1b2   :  { %v957_v24 = vpop.f32.mrf.mxu1 }
 0x1b3   :  { %2993 = vpow2.f32 %v2907_v63  ;;  %v2910_v11 = vmul.f32 -1.442695, %v3716_v37  ;;  %v3721_v20 = vadd.f32 %v957_v24, %v857_v17  ;;  %v3723_v18 = vpop.f32.mrf.mxu0  ;;  %v3756_v1 = vand.u32 4294901760, %v1848_v0 }
 0x1b4   :  { %v2984_v25 = vpop.eup %2983  ;;  %v3725_v49 = vpop.f32.mrf.mxu1 }
 0x1b5   :  { %v1698_v54 = vadd.f32 1.0, %v2984_v25  ;;  %2995 = vpow2.f32 %v2910_v11  ;;  %v2911_v55 = vmul.f32 -1.442695, %v3721_v20  ;;  %v3728_v3 = vpop.f32.mrf.mxu0 }
 0x1b6   :  { %v2986_v59 = vpop.eup %2985  ;;  %v3733_v30 = vpop.f32.mrf.mxu1 }
 0x1b7   :  { %2997 = vrcp.f32 %v1698_v54  ;;  %v1699_v34 = vadd.f32 1.0, %v2986_v59  ;;  %v1063_v48 = vpop.f32.mrf.mxu0  ;;  %v1040_v54 = vadd.f32 %v3704_v19, %v3679_v21  ;;  %v1051_v59 = vadd.f32 %v3718_v10, %v3683_v42 }
 0x1b8   :  { %2999 = vpow2.f32 %v2911_v55  ;;  %v1062_v19 = vadd.f32 %v3728_v3, %v3673_v4  ;;  %v1064_v10 = vadd.f32 %v1063_v48, %v3673_v4 }
 0x1b9   :  { %3001 = vrcp.f32 %v1699_v34  ;;  %v1072_v6 = vpop.f32.mrf.mxu0  ;;  %v1053_v34 = vadd.f32 %v3723_v18, %v3683_v42  ;;  %v1187_v42 = vadd.f32 %v3733_v30, %v1042_v9 }
 0x1ba   :  { %v2988_v15 = vpop.eup %2987  ;;  %v1191_v52 = vpop.f32.mrf.mxu1  ;;  %v1073_v18 = vadd.f32 %v1072_v6, %v3675_v12 }
 0x1bb   :  { %v1702_v16 = vadd.f32 1.0, %v2988_v15  ;;  %v1074_v39 = vpop.f32.mrf.mxu0 }
 0x1bc   :  { %v2990_v44 = vpop.eup %2989  ;;  %v1193_v62 = vpop.f32.mrf.mxu1 }
 0x1bd   :  { %3003 = vrcp.f32 %v1702_v16  ;;  %v1703_v33 = vadd.f32 1.0, %v2990_v44  ;;  %v1294_v53 = vpop.f32.mrf.mxu0  ;;  %v1185_v44 = vadd.f32 %v3725_v49, %v1040_v54 }
 0x1be   :  { %v2992_v7 = vpop.eup %2991  ;;  %v1198_v29 = vpop.f32.mrf.mxu1 }
 0x1bf   :  { %3005 = vrcp.f32 %v1703_v33  ;;  %v1706_v58 = vadd.f32 1.0, %v2992_v7  ;;  %v1296_v23 = vpop.f32.mrf.mxu0 }
 0x1c0   :  { %v2994_v50 = vpop.eup %2993  ;;  %v1200_v46 = vpop.f32.mrf.mxu1 }
 0x1c1   :  { %3007 = vrcp.f32 %v1706_v58  ;;  %v1707_v60 = vadd.f32 1.0, %v2994_v50  ;;  %v1192_v58 = vadd.f32 %v1191_v52, %v1051_v59  ;;  %v1075_v50 = vadd.f32 %v1074_v39, %v3675_v12 }
 0x1c2   :  { %v2996_v35 = vpop.eup %2995  ;;  %v1205_v61 = vpop.f32.mrf.mxu1  ;;  %v1201_v6 = vadd.f32 %v1200_v46, %v1064_v10 }
 0x1c3   :  { %3009 = vrcp.f32 %v1707_v60  ;;  %v1710_v36 = vadd.f32 1.0, %v2996_v35  ;;  %v1302_v13 = vpop.f32.mrf.mxu0  ;;  %v1295_v60 = vadd.f32 %v1294_v53, %v1185_v44  ;;  %v1206_v52 = vadd.f32 %v1205_v61, %v1073_v18 }
 0x1c4   :  { %v2998_v45 = vpop.eup %2997  ;;  %v1207_v2 = vpop.f32.mrf.mxu1 }
 0x1c5   :  { %v3000_v22 = vpop.eup %2999  ;;  %3011 = vrcp.f32 %v1710_v36  ;;  %v1304_v32 = vpop.f32.mrf.mxu0  ;;  %v1746_v17 = vmul.f32 %v2998_v45, %v3688_v8  ;;  %v1199_v36 = vadd.f32 %v1198_v29, %v1062_v19  ;;  %v1297_v45 = vadd.f32 %v1296_v23, %v1187_v42 }
 0x1c6   :  { %v3002_v47 = vpop.eup %3001  ;;  %v1711_v41 = vadd.f32 1.0, %v3000_v22  ;;  %v1400_v56 = vpop.f32.mrf.mxu1 }
 0x1c7   :  { %v1310_v26 = vpop.f32.mrf.mxu0  ;;  %v1747_v24 = vmul.f32 %v3002_v47, %v3692_v31  ;;  %v3758_v31 = vand.u32 4294901760, %v1746_v17  ;;  %v1401_v0 = vadd.f32 %v1400_v56, %v1295_v60 }
 0x1c8   :  { %3013 = vrcp.f32 %v1711_v41  ;;  %v1402_v63 = vpop.f32.mrf.mxu1  ;;  %v1311_v41 = vadd.f32 %v1310_v26, %v1199_v36 }
 0x1c9   :  { %v1312_v11 = vpop.f32.mrf.mxu0  ;;  %v3764_v28 = vand.u32 4294901760, %v1747_v24  ;;  %v3773_v30 = vsub.f32 %v1746_v17, %v3758_v31 }
 0x1ca   :  { %v3004_v25 = vpop.eup %3003  ;;  %v1409_v55 = vpop.f32.mrf.mxu1 }
 0x1cb   :  { %v1318_v8 = vpop.f32.mrf.mxu0  ;;  %v1750_v16 = vmul.f32 %v3004_v25, %v3698_v57  ;;  %v1194_v57 = vadd.f32 %v1193_v62, %v1053_v34  ;;  %v3778_v12 = vsub.f32 %v1747_v24, %v3764_v28  ;;  %v1208_v62 = vadd.f32 %v1207_v2, %v1075_v50 }
 0x1cc   :  { %v3006_v15 = vpop.eup %3005  ;;  %v1411_v21 = vpop.f32.mrf.mxu1  ;;  %v1403_v24 = vadd.f32 %v1402_v63, %v1297_v45  ;;  %v1313_v2 = vadd.f32 %v1312_v11, %v1201_v6  ;;  %v1319_v56 = vadd.f32 %v1318_v8, %v1206_v52 }
 0x1cd   :  { %v1320_v33 = vpop.f32.mrf.mxu0  ;;  %v1751_v3 = vmul.f32 %v3006_v15, %v3702_v38  ;;  %v3775_v48 = vand.u32 4294901760, %v1750_v16  ;;  %v1303_v38 = vadd.f32 %v1302_v13, %v1192_v58  ;;  %v1305_v23 = vadd.f32 %v1304_v32, %v1194_v57 }
 0x1ce   :  { %v3008_v7 = vpop.eup %3007  ;;  %v1418_v35 = vpop.f32.mrf.mxu1  ;;  %v1918_v19 = vand.u32 4294901760, %v3778_v12  ;;  %v1321_v8 = vadd.f32 %v1320_v33, %v1208_v62 }
 0x1cf   :  { %v1754_v49 = vmul.f32 %v3008_v7, %v3708_v5  ;;  %v1523_v22 = vpop.f32.mrf.mxu0  ;;  %v3783_v25 = vand.u32 4294901760, %v1751_v3  ;;  %v3790_v13 = vsub.f32 %v1750_v16, %v3775_v48  ;;  %v1410_v9 = vadd.f32 %v1409_v55, %v1303_v38 }
 0x1d0   :  { %v3010_v4 = vpop.eup %3009  ;;  %v1420_v47 = vpop.f32.mrf.mxu1  ;;  %v1412_v34 = vadd.f32 %v1411_v21, %v1305_v23  ;;  %v1524_v44 = vadd.f32 %v1523_v22, %v1401_v0  ;;  %v1419_v58 = vadd.f32 %v1418_v35, %v1311_v41 }
 0x1d1   :  { %v1755_v39 = vmul.f32 %v3010_v4, %v3713_v27  ;;  %v1525_v5 = vpop.f32.mrf.mxu0  ;;  %v3781_v29 = vand.u32 4294901760, %v1754_v49  ;;  %v1924_v27 = vand.u32 4294901760, %v3773_v30  ;;  %v3803_v55 = vsub.f32 %v1751_v3, %v3783_v25 }
 0x1d2   :  { %v3012_v53 = vpop.eup %3011  ;;  %v1427_v17 = vpop.f32.mrf.mxu1  ;;  %v1526_v21 = vadd.f32 %v1525_v5, %v1403_v24  ;;  %v1912_v18 = vand.u32 4294901760, %v3790_v13  ;;  %v1421_v60 = vadd.f32 %v1420_v47, %v1313_v2 }
 0x1d3   :  { %v3785_v46 = vand.u32 4294901760, %v1755_v39  ;;  %v1758_v61 = vmul.f32 %v3012_v53, %v3716_v37  ;;  %v1530_v54 = vpop.f32.mrf.mxu0  ;;  %v3796_v37 = vsub.f32 %v1754_v49, %v3781_v29  ;;  %v1428_v22 = vadd.f32 %v1427_v17, %v1319_v56 }
 0x1d4   :  { %v1429_v59 = vpop.f32.mrf.mxu1  ;;  %v1531_v49 = vadd.f32 %v1530_v54, %v1410_v9  ;;  %v1906_v47 = vand.u32 4294901760, %v3803_v55  ;;  %v1913_v41 = vsub.f32 %v3790_v13, %v1912_v18 }
 0x1d5   :  { %v3014_v32 = vpop.eup %3013  ;;  %v3792_v26 = vand.u32 4294901760, %v1758_v61  ;;  %v1532_v15 = vpop.f32.mrf.mxu0  ;;  %v3799_v63 = vsub.f32 %v1755_v39, %v3785_v46  ;;  %v1900_v45 = vand.u32 4294901760, %v3796_v37  ;;  %v1430_v24 = vadd.f32 %v1429_v59, %v1321_v8 }
 0x1d6   :  { %v1759_v16 = vmul.f32 %v3014_v32, %v3721_v20  ;;  %v1624_v11 = vpop.f32.mrf.mxu1  ;;  %v1533_v6 = vadd.f32 %v1532_v15, %v1412_v34  ;;  %v1907_v8 = vsub.f32 %v3803_v55, %v1906_v47 }
 0x1d7   :  { %v3806_v10 = vsub.f32 %v1758_v61, %v3792_v26  ;;  %v1537_v42 = vpop.f32.mrf.mxu0  ;;  %v3811_v50 = vadd.f32 %v1624_v11, %v1524_v44  ;;  %v1894_v35 = vand.u32 4294901760, %v3799_v63  ;;  %v1901_v32 = vsub.f32 %v3796_v37, %v1900_v45 }
 0x1d8   :  { %v3809_v7 = vand.u32 4294901760, %v1759_v16  ;;  %v1626_v57 = vpop.f32.mrf.mxu1  ;;  %v1538_v38 = vadd.f32 %v1537_v42, %v1419_v58 }
 0x1d9   :  { %v1888_v20 = vand.u32 4294901760, %v3806_v10  ;;  %v1539_v3 = vpop.f32.mrf.mxu0  ;;  %v3814_v36 = vadd.f32 %v1626_v57, %v1526_v21  ;;  %v2900_v62 = vmul.f32 -1.442695, %v3811_v50  ;;  %v1895_v9 = vsub.f32 %v3799_v63, %v1894_v35 }
 0x1da   :  { %v3818_v33 = vsub.f32 %v1759_v16, %v3809_v7  ;;  %v1631_v4 = vpop.f32.mrf.mxu1  ;;  %1797 = vmatprep.subr.mxu0 %v3809_v7  ;;  %v1540_v56 = vadd.f32 %v1539_v3, %v1421_v60  ;;  %v1919_v3 = vsub.f32 %v3778_v12, %v1918_v19 }
 0x1db   :  { %v2901_v52 = vmul.f32 -1.442695, %v3814_v36  ;;  %v3823_v39 = vadd.f32 %v1631_v4, %v1531_v49  ;;  %1799 = vmatpush1.msra.mxu0 %v3792_v26  ;;  %v1544_v5 = vpop.f32.mrf.mxu0  ;;  %v1889_v61 = vsub.f32 %v3806_v10, %v1888_v20  ;;  %v1896_v60 = vand.u32 4294901760, %v1895_v9 }
 0x1dc   :  { %v1633_v53 = vpop.f32.mrf.mxu1  ;;  %1801 = vmatprep.subr.mxu0 %v3785_v46  ;;  %v1882_v23 = vand.u32 4294901760, %v3818_v33  ;;  %v1545_v15 = vadd.f32 %v1544_v5, %v1428_v22  ;;  %v1902_v49 = vand.u32 4294901760, %v1901_v32  ;;  %v1925_v22 = vsub.f32 %v3773_v30, %v1924_v27 }
 0x1dd   :  { %3015 = vpow2.f32 %v2901_v52  ;;  %v2904_v0 = vmul.f32 -1.442695, %v3823_v39  ;;  %v3834_v17 = vadd.f32 %v1633_v53, %v1533_v6  ;;  %1803 = vmatpush1.msra.mxu0 %v3781_v29  ;;  %v1546_v16 = vpop.f32.mrf.mxu0  ;;  %v1890_v58 = vand.u32 4294901760, %v1889_v61 }
 0x1de   :  { %v1638_v54 = vpop.f32.mrf.mxu1  ;;  %1805 = vmatprep.subr.mxu0 %v3783_v25  ;;  %v1883_v2 = vsub.f32 %v3818_v33, %v1882_v23  ;;  %v1547_v4 = vadd.f32 %v1546_v16, %v1430_v24  ;;  %v1920_v61 = vand.u32 4294901760, %v1919_v3 }
 0x1df   :  { %3017 = vpow2.f32 %v2904_v0  ;;  %v2905_v34 = vmul.f32 -1.442695, %v3834_v17  ;;  %v3851_v59 = vadd.f32 %v1638_v54, %v1538_v38  ;;  %1807 = vmatpush1.msra.mxu0 %v3775_v48  ;;  %v1914_v0 = vand.u32 4294901760, %v1913_v41 }
 0x1e0   :  { %3019 = vpow2.f32 %v2900_v62  ;;  %v1640_v44 = vpop.f32.mrf.mxu1  ;;  %1809 = vmatprep.subr.mxu0 %v3764_v28  ;;  %v1884_v11 = vand.u32 4294901760, %v1883_v2  ;;  %v1908_v62 = vand.u32 4294901760, %v1907_v8  ;;  %v1926_v54 = vand.u32 4294901760, %v1925_v22 }
 0x1e1   :  { %3021 = vpow2.f32 %v2905_v34  ;;  %v2908_v21 = vmul.f32 -1.442695, %v3851_v59  ;;  %v3859_v42 = vadd.f32 %v1640_v44, %v1540_v56  ;;  %1811 = vmatpush1.msra.mxu0 %v3758_v31 }
 0x1e2   :  { %v1645_v57 = vpop.f32.mrf.mxu1  ;;  %1850 = vmatmul.mubr.f32.vlgmr.msra.gmra.mxu0 %v3756_v1  ;;  %1885 = vmatprep.subr.mxu1 %v1884_v11 }
 0x1e3   :  { %3023 = vpow2.f32 %v2908_v21  ;;  %v2909_v6 = vmul.f32 -1.442695, %v3859_v42  ;;  %v3870_v52 = vadd.f32 %v1645_v57, %v1545_v15  ;;  %1994 = vmatprep.subr.mxu0 %v3818_v33  ;;  %1891 = vmatpush1.msra.mxu1 %v1890_v58 }
 0x1e4   :  { %v1647_v38 = vpop.f32.mrf.mxu1  ;;  %1997 = vmatpush1.msra.mxu0 %v3806_v10  ;;  %1897 = vmatprep.subr.mxu1 %v1896_v60 }
 0x1e5   :  { %3025 = vpow2.f32 %v2909_v6  ;;  %v2912_v5 = vmul.f32 -1.442695, %v3870_v52  ;;  %v3875_v53 = vadd.f32 %v1647_v38, %v1547_v4  ;;  %2000 = vmatprep.subr.mxu0 %v3799_v63  ;;  %1903 = vmatpush1.msra.mxu1 %v1902_v49 }
 0x1e6   :  { %2003 = vmatpush1.msra.mxu0 %v3796_v37  ;;  %1909 = vmatprep.subr.mxu1 %v1908_v62 }
 0x1e7   :  { %3027 = vpow2.f32 %v2912_v5  ;;  %v2913_v24 = vmul.f32 -1.442695, %v3875_v53  ;;  %2006 = vmatprep.subr.mxu0 %v3803_v55  ;;  %1915 = vmatpush1.msra.mxu1 %v1914_v0 }
 0x1e8   :  { %2009 = vmatpush1.msra.mxu0 %v3790_v13  ;;  %1921 = vmatprep.subr.mxu1 %v1920_v61 }
 0x1e9   :  { %3029 = vpow2.f32 %v2913_v24  ;;  %2012 = vmatprep.subr.mxu0 %v3778_v12  ;;  %1927 = vmatpush1.msra.mxu1 %v1926_v54 }
 0x1ea   :  { %v3016_v2 = vpop.eup %3015  ;;  %2015 = vmatpush1.msra.mxu0 %v3773_v30  ;;  %1962 = vmatmul.mubr.f32.vlgmr.msra.gmra.mxu1 %v3736_v51 }
 0x1eb   :  { %2048 = vmatprep.mubr.f32.mxu0 %v3070_v14  ;;  %2082 = vmatprep.subr.mxu1 %v3809_v7  ;;  %v1701_v9 = vadd.f32 1.0, %v3016_v2 }
 0x1ec   :  { %v3018_v41 = vpop.eup %3017  ;;  %2166 = vmatprep.subr.mxu0 %v1882_v23  ;;  %2051 = vmatmul.mubr.f32.vlgmr.msra.gmra.mxu0 %v3739_v40 }
 0x1ed   :  { %v3020_v32 = vpop.eup %3019  ;;  %2084 = vmatpush1.msra.mxu1 %v3792_v26  ;;  %2170 = vmatpush1.msra.mxu0 %v1888_v20  ;;  %v1704_v34 = vadd.f32 1.0, %v3018_v41  ;;  %3031 = vrcp.f32 %v1701_v9 }
 0x1ee   :  { %v3022_v56 = vpop.eup %3021  ;;  %2086 = vmatprep.subr.mxu1 %v3785_v46  ;;  %2174 = vmatprep.subr.mxu0 %v1894_v35  ;;  %v1700_v23 = vadd.f32 1.0, %v3020_v32 }
 0x1ef   :  { %v1705_v15 = vadd.f32 1.0, %v3022_v56  ;;  %2088 = vmatpush1.msra.mxu1 %v3781_v29  ;;  %2178 = vmatpush1.msra.mxu0 %v1900_v45 }
 0x1f0   :  { %v3024_v33 = vpop.eup %3023  ;;  %2090 = vmatprep.subr.mxu1 %v3783_v25  ;;  %2182 = vmatprep.subr.mxu0 %v1906_v47 }
 0x1f1   :  { %3033 = vrcp.f32 %v1705_v15  ;;  %v1708_v10 = vadd.f32 1.0, %v3024_v33  ;;  %2092 = vmatpush1.msra.mxu1 %v3775_v48  ;;  %2186 = vmatpush1.msra.mxu0 %v1912_v18 }
 0x1f2   :  { %v3026_v63 = vpop.eup %3025  ;;  %3035 = vrcp.f32 %v1704_v34  ;;  %2094 = vmatprep.subr.mxu1 %v3764_v28  ;;  %2190 = vmatprep.subr.mxu0 %v1918_v19 }
 0x1f3   :  { %3037 = vrcp.f32 %v1708_v10  ;;  %v1709_v37 = vadd.f32 1.0, %v3026_v63  ;;  %2096 = vmatpush1.msra.mxu1 %v3758_v31  ;;  %2129 = vmatprep.mubr.f32.mxu1 %v3070_v14 }
 0x1f4   :  { %v3028_v55 = vpop.eup %3027  ;;  %3039 = vrcp.f32 %v1700_v23  ;;  %2194 = vmatpush1.msra.mxu0 %v1924_v27  ;;  %2133 = vmatmul.mubr.f32.vlgmr.msra.gmra.mxu1 %v3742_v43 }
 0x1f5   :  { %3041 = vrcp.f32 %v1709_v37  ;;  %v1712_v13 = vadd.f32 1.0, %v3028_v55  ;;  %2260 = vmatprep.subr.mxu1 %v3809_v7  ;;  %2227 = vmatprep.mubr.f32.mxu0 %v3070_v14 }
 0x1f6   :  { %v3030_v12 = vpop.eup %3029  ;;  %2262 = vmatpush1.msra.mxu1 %v3792_v26  ;;  %2229 = vmatmul.mubr.f32.vlgmr.msra.gmra.mxu0 %v3736_v51 }
 0x1f7   :  { %3043 = vrcp.f32 %v1712_v13  ;;  %v1713_v19 = vadd.f32 1.0, %v3030_v12  ;;  %2264 = vmatprep.subr.mxu1 %v3785_v46  ;;  %2307 = vmatprep.mubr.f32.mxu1 %v3070_v14  ;;  %v1767_v13 = vpop.permute.xlu0 %1766 }
 0x1f8   :  { %2266 = vmatpush1.msra.mxu1 %v3781_v29  ;;  %2387 = vmatprep.mubr.f32.mxu0 %v3070_v14 }
 0x1f9   :  { %3045 = vrcp.f32 %v1713_v19  ;;  %2268 = vmatprep.subr.mxu1 %v3783_v25 }
 0x1fa   :  { %2270 = vmatpush1.msra.mxu1 %v3775_v48  ;;  %v3032_v30 = vpop.eup %3031 }
 0x1fb   :  { %2272 = vmatprep.subr.mxu1 %v3764_v28  ;;  %v1749_v28 = vmul.f32 %v3032_v30, %v3814_v36 }
 0x1fc   :  { %2274 = vmatpush1.msra.mxu1 %v3758_v31 }
 0x1fd   :  { %2309 = vmatmul.mubr.f32.vlgmr.msra.gmra.mxu1 %v3736_v51  ;;  %v3942_v11 = vand.u32 4294901760, %v1749_v28 }
 0x1fe   :  { %v3034_v27 = vpop.eup %3033  ;;  %2503 = vmatprep.mubr.f32.mxu1 %v3070_v14 }
 0x1ff   :  { %v3036_v46 = vpop.eup %3035  ;;  %v1753_v18 = vmul.f32 %v3034_v27, %v3834_v17  ;;  %v3965_v49 = vsub.f32 %v1749_v28, %v3942_v11 }
 0x200   :  { %v3038_v26 = vpop.eup %3037  ;;  %v1752_v48 = vmul.f32 %v3036_v46, %v3823_v39 }
 0x201   :  { %v3040_v29 = vpop.eup %3039  ;;  %v1756_v7 = vmul.f32 %v3038_v26, %v3851_v59  ;;  %v3935_v47 = vand.u32 4294901760, %v1753_v18  ;;  %v2461_v24 = vand.u32 4294901760, %v3965_v49 }
 0x202   :  { %v3042_v25 = vpop.eup %3041  ;;  %v1748_v45 = vmul.f32 %v3040_v29, %v3811_v50  ;;  %v3940_v59 = vand.u32 4294901760, %v1752_v48 }
 0x203   :  { %v1757_v31 = vmul.f32 %v3042_v25, %v3859_v42  ;;  %v3933_v35 = vand.u32 4294901760, %v1756_v7  ;;  %v3956_v42 = vsub.f32 %v1753_v18, %v3935_v47  ;;  %v2462_v15 = vsub.f32 %v3965_v49, %v2461_v24 }
 0x204   :  { %v3044_v20 = vpop.eup %3043  ;;  %v3950_v8 = vand.u32 4294901760, %v1748_v45  ;;  %v3962_v60 = vsub.f32 %v1752_v48, %v3940_v59 }
 0x205   :  { %v3937_v16 = vand.u32 4294901760, %v1757_v31  ;;  %v1760_v17 = vmul.f32 %v3044_v20, %v3870_v52  ;;  %v3953_v21 = vsub.f32 %v1756_v7, %v3933_v35  ;;  %v2449_v62 = vand.u32 4294901760, %v3956_v42 }
 0x206   :  { %v3046_v44 = vpop.eup %3045  ;;  %v3971_v6 = vsub.f32 %v1748_v45, %v3950_v8  ;;  %v2455_v5 = vand.u32 4294901760, %v3962_v60 }
 0x207   :  { %v3945_v36 = vsub.f32 %v1757_v31, %v3937_v16  ;;  %v3947_v39 = vand.u32 4294901760, %v1760_v17  ;;  %v1761_v50 = vmul.f32 %v3046_v44, %v3875_v53  ;;  %v2443_v52 = vand.u32 4294901760, %v3953_v21 }
 0x208   :  { %v2467_v54 = vand.u32 4294901760, %v3971_v6  ;;  %v2450_v9 = vsub.f32 %v3956_v42, %v2449_v62  ;;  %v2456_v56 = vsub.f32 %v3962_v60, %v2455_v5 }
 0x209   :  { %v2430_v58 = vsub.f32 %v1760_v17, %v3947_v39  ;;  %v3959_v57 = vand.u32 4294901760, %v1761_v50  ;;  %v2437_v4 = vand.u32 4294901760, %v3945_v36  ;;  %v2444_v2 = vsub.f32 %v3953_v21, %v2443_v52 }
 0x20a   :  { %v2468_v23 = vsub.f32 %v3971_v6, %v2467_v54  ;;  %v2451_v10 = vand.u32 4294901760, %v2450_v9  ;;  %v2457_v63 = vand.u32 4294901760, %v2456_v56 }
 0x20b   :  { %v2431_v3 = vand.u32 4294901760, %v2430_v58  ;;  %v2424_v22 = vsub.f32 %v1761_v50, %v3959_v57  ;;  %2340 = vmatprep.subr.mxu0 %v3959_v57  ;;  %v2438_v61 = vsub.f32 %v3945_v36, %v2437_v4  ;;  %v2445_v33 = vand.u32 4294901760, %v2444_v2 }
 0x20c   :  { %2342 = vmatpush1.msra.mxu0 %v3947_v39  ;;  %v2469_v37 = vand.u32 4294901760, %v2468_v23 }
 0x20d   :  { %2344 = vmatprep.subr.mxu0 %v3937_v16  ;;  %v2425_v38 = vand.u32 4294901760, %v2424_v22  ;;  %v2432_v53 = vsub.f32 %v2430_v58, %v2431_v3  ;;  %v2439_v34 = vand.u32 4294901760, %v2438_v61 }
 0x20e   :  { %2346 = vmatpush1.msra.mxu0 %v3933_v35 }
 0x20f   :  { %2348 = vmatprep.subr.mxu0 %v3935_v47  ;;  %v2426_v0 = vsub.f32 %v2424_v22, %v2425_v38  ;;  %v2433_v32 = vand.u32 4294901760, %v2432_v53 }
 0x210   :  { %2350 = vmatpush1.msra.mxu0 %v3940_v59 }
 0x211   :  { %2352 = vmatprep.subr.mxu0 %v3942_v11  ;;  %v2427_v41 = vand.u32 4294901760, %v2426_v0 }
 0x212   :  { %2354 = vmatpush1.msra.mxu0 %v3950_v8 }
 0x213   :  { %2393 = vmatmul.mubr.f32.vlgmr.msra.gmra.mxu0 %v3756_v1  ;;  %2428 = vmatprep.subr.mxu1 %v2427_v41  ;;  %v2463_v1 = vand.u32 4294901760, %v2462_v15 }
 0x214   :  { %2537 = vmatprep.subr.mxu0 %v2424_v22  ;;  %2434 = vmatpush1.msra.mxu1 %v2433_v32 }
 0x215   :  { %2540 = vmatpush1.msra.mxu0 %v2430_v58  ;;  %2440 = vmatprep.subr.mxu1 %v2439_v34 }
 0x216   :  { %2543 = vmatprep.subr.mxu0 %v3945_v36  ;;  %2446 = vmatpush1.msra.mxu1 %v2445_v33 }
 0x217   :  { %2546 = vmatpush1.msra.mxu0 %v3953_v21  ;;  %2452 = vmatprep.subr.mxu1 %v2451_v10 }
 0x218   :  { %2549 = vmatprep.subr.mxu0 %v3956_v42  ;;  %2458 = vmatpush1.msra.mxu1 %v2457_v63 }
 0x219   :  { %2552 = vmatpush1.msra.mxu0 %v3962_v60  ;;  %2464 = vmatprep.subr.mxu1 %v2463_v1 }
 0x21a   :  { %2555 = vmatprep.subr.mxu0 %v3965_v49  ;;  %2470 = vmatpush1.msra.mxu1 %v2469_v37 }
 0x21b   :  { %2558 = vmatpush1.msra.mxu0 %v3971_v6  ;;  %2505 = vmatmul.mubr.f32.vlgmr.msra.gmra.mxu1 %v3736_v51 }
 0x21c   :  { %2591 = vmatprep.mubr.f32.mxu0 %v3070_v14  ;;  %2625 = vmatprep.subr.mxu1 %v3959_v57 }
 0x21d   :  { %2709 = vmatprep.subr.mxu0 %v2425_v38  ;;  %2594 = vmatmul.mubr.f32.vlgmr.msra.gmra.mxu0 %v3739_v40 }
 0x21e   :  { %2627 = vmatpush1.msra.mxu1 %v3947_v39  ;;  %2713 = vmatpush1.msra.mxu0 %v2431_v3 }
 0x21f   :  { %2629 = vmatprep.subr.mxu1 %v3937_v16  ;;  %2717 = vmatprep.subr.mxu0 %v2437_v4 }
 0x220   :  { %2631 = vmatpush1.msra.mxu1 %v3933_v35  ;;  %2721 = vmatpush1.msra.mxu0 %v2443_v52 }
 0x221   :  { %2633 = vmatprep.subr.mxu1 %v3935_v47  ;;  %2725 = vmatprep.subr.mxu0 %v2449_v62 }
 0x222   :  { %2635 = vmatpush1.msra.mxu1 %v3940_v59  ;;  %2729 = vmatpush1.msra.mxu0 %v2455_v5 }
 0x223   :  { %2637 = vmatprep.subr.mxu1 %v3942_v11  ;;  %2733 = vmatprep.subr.mxu0 %v2461_v24 }
 0x224   :  { %2639 = vmatpush1.msra.mxu1 %v3950_v8  ;;  %2672 = vmatprep.mubr.f32.mxu1 %v3070_v14 }
 0x225   :  { %2737 = vmatpush1.msra.mxu0 %v2467_v54  ;;  %2676 = vmatmul.mubr.f32.vlgmr.msra.gmra.mxu1 %v3742_v43 }
 0x226   :  { %2803 = vmatprep.subr.mxu1 %v3959_v57  ;;  %2770 = vmatprep.mubr.f32.mxu0 %v3070_v14 }
 0x227   :  { %2805 = vmatpush1.msra.mxu1 %v3947_v39  ;;  %2772 = vmatmul.mubr.f32.vlgmr.msra.gmra.mxu0 %v3736_v51 }
 0x228   :  { %2807 = vmatprep.subr.mxu1 %v3937_v16  ;;  %2850 = vmatprep.mubr.f32.mxu1 %v3070_v14 }
 0x229   :  { %2809 = vmatpush1.msra.mxu1 %v3933_v35 }
 0x22a   :  { %2811 = vmatprep.subr.mxu1 %v3935_v47 }
 0x22b   :  { %2813 = vmatpush1.msra.mxu1 %v3940_v59 }
 0x22c   :  { %2815 = vmatprep.subr.mxu1 %v3942_v11 }
 0x22d   :  { %2817 = vmatpush1.msra.mxu1 %v3950_v8 }
 0x22e   :  { %2852 = vmatmul.mubr.f32.vlgmr.msra.gmra.mxu1 %v3736_v51 }
 0x2a2   :  { %v1851_v40 = vpop.f32.mrf.mxu0 }
 0x2a3   :  { %v1852_v30 = vadd.f32 %v1851_v40, %v1767_v13 }
 0x2a4   :  { %v1853_v55 = vpop.f32.mrf.mxu0 }
 0x2a5   :  { %v1854_v14 = vadd.f32 %v1853_v55, %v1767_v13 }
 0x2aa   :  { %v1963_v43 = vpop.f32.mrf.mxu1 }
 0x2ab   :  { %v1964_v27 = vadd.f32 %v1963_v43, %v1852_v30 }
 0x2ac   :  { %v1965_v12 = vpop.f32.mrf.mxu1  ;;  %v2052_v19 = vpop.f32.mrf.mxu0 }
 0x2ad   :  { %v1966_v46 = vadd.f32 %v1965_v12, %v1854_v14  ;;  %v2053_v25 = vadd.f32 %v2052_v19, %v1964_v27 }
 0x2ae   :  { %v2054_v29 = vpop.f32.mrf.mxu0 }
 0x2af   :  { %v2055_v48 = vadd.f32 %v2054_v29, %v1966_v46 }
 0x2b4   :  { %v2134_v26 = vpop.f32.mrf.mxu1 }
 0x2b5   :  { %v2135_v28 = vadd.f32 %v2134_v26, %v2053_v25 }
 0x2b6   :  { %v2136_v18 = vpop.f32.mrf.mxu1  ;;  %v2230_v7 = vpop.f32.mrf.mxu0 }
 0x2b7   :  { %v2137_v31 = vadd.f32 %v2136_v18, %v2055_v48  ;;  %v2231_v45 = vadd.f32 %v2230_v7, %v2135_v28 }
 0x2b8   :  { %v2232_v20 = vpop.f32.mrf.mxu0 }
 0x2b9   :  { %v2233_v35 = vadd.f32 %v2232_v20, %v2137_v31 }
 0x2bd   :  { %v2310_v51 = vpop.f32.mrf.mxu1 }
 0x2be   :  { %v2311_v16 = vadd.f32 %v2310_v51, %v2231_v45 }
 0x2bf   :  { %v2312_v47 = vpop.f32.mrf.mxu1 }
 0x2c0   :  { %v2313_v17 = vadd.f32 %v2312_v47, %v2233_v35 }
 0x2c2   :  { %v2862_v44 = vcombine.low %v2311_v16, %v2313_v17 }
 0x2c4   :  { %2866 = vst [vmem:[#allocation2] sm:$0xff] %v2862_v44 }
 0x2d3   :  { %v2394_v59 = vpop.f32.mrf.mxu0 }
 0x2d4   :  { %v2395_v8 = vadd.f32 %v2394_v59, %v1767_v13 }
 0x2d5   :  { %v2396_v36 = vpop.f32.mrf.mxu0 }
 0x2d6   :  { %v2397_v21 = vadd.f32 %v2396_v36, %v1767_v13 }
 0x2db   :  { %v2506_v11 = vpop.f32.mrf.mxu1 }
 0x2dc   :  { %v2507_v42 = vadd.f32 %v2506_v11, %v2395_v8 }
 0x2dd   :  { %v2508_v39 = vpop.f32.mrf.mxu1  ;;  %v2595_v50 = vpop.f32.mrf.mxu0 }
 0x2de   :  { %v2509_v58 = vadd.f32 %v2508_v39, %v2397_v21  ;;  %v2596_v22 = vadd.f32 %v2595_v50, %v2507_v42 }
 0x2df   :  { %v2597_v60 = vpop.f32.mrf.mxu0 }
 0x2e0   :  { %v2598_v4 = vadd.f32 %v2597_v60, %v2509_v58 }
 0x2e5   :  { %v2677_v57 = vpop.f32.mrf.mxu1 }
 0x2e6   :  { %v2678_v6 = vadd.f32 %v2677_v57, %v2596_v22 }
 0x2e7   :  { %v2679_v49 = vpop.f32.mrf.mxu1  ;;  %v2773_v3 = vpop.f32.mrf.mxu0 }
 0x2e8   :  { %v2680_v52 = vadd.f32 %v2679_v49, %v2598_v4  ;;  %v2774_v5 = vadd.f32 %v2773_v3, %v2678_v6 }
 0x2e9   :  { %v2775_v38 = vpop.f32.mrf.mxu0 }
 0x2ea   :  { %v2776_v53 = vadd.f32 %v2775_v38, %v2680_v52 }
 0x2ee   :  { %v2853_v62 = vpop.f32.mrf.mxu1 }
 0x2ef   :  { %v2854_v61 = vadd.f32 %v2853_v62, %v2774_v5 }
 0x2f0   :  { %v2855_v0 = vpop.f32.mrf.mxu1 }
 0x2f1   :  { %v2856_v24 = vadd.f32 %v2855_v0, %v2776_v53 }
 0x2f3   :  { %v2863_v54 = vcombine.low %v2854_v61, %v2856_v24 }
 0x2f5   :  { %2867 = vst [vmem:[#allocation2 + $0x8] sm:$0xff] %v2863_v54 }
 0x2f6   :  { %3058 = shalt.err (!%p3055_p4)
}
 0x2f7   :  { %2877 = dma.vmem_to_hbm [thread:$0]  %s2875_s28, 256, %s4032_s6, [#allocation3]  }
 0x2f8   :  { %3067 = dma.done.wait [#allocation3], 256  }
 0x2f9   :  { %3068 = vsyncadd [#allocation3], 4294967040 }
 0x2fa   :  { %2881 = vsyncpa [#allocation3], 1 }

</bundles_post_ra>
